<compile_context>
chip_gen: v6e
topology: v6e:2x2x1
jax: 0.10.0
libtpu: 0.0.40
codegen_flags: <defaults>
</compile_context>

<pallas_src>
import jax
import jax.numpy as jnp
from jax.experimental import pallas as pl
from jax.experimental.pallas import tpu as pltpu


def _round_up(x, m):
    return (x + m - 1) // m * m


def _tpu_vmem_capacity_bytes():
    """Physical VMEM per TensorCore (128 MiB v5e/v6e, 64 MiB v7x)."""
    try:
        return int(pltpu.get_tpu_info().vmem_capacity_bytes)
    except Exception:
        return 64 << 20   # safe (smallest-chip) fallback if introspection fails


# ----------------------------------------------------------------------------
# Kernels
# ----------------------------------------------------------------------------

def hourglass_mlp_resident_kernel(x_ref, w_in_ref, b_in_ref, w_h_ref, b_h_ref,
                                  w_out_ref, b_out_ref, o_ref):
    """1-D grid over batch tiles; ALL weights VMEM-resident; hidden layers
    statically unrolled inside the body (no layer grid axis, no scratch)."""
    # Input layer: Linear + ReLU.  x arrives f32 and is cast to bf16 here
    # (cheaper than a wrapper-side cast: 4 B/elem of HBM traffic instead of 8).
    x = x_ref[...].astype(jnp.bfloat16)
    h = jnp.dot(x, w_in_ref[...], preferred_element_type=jnp.float32)
    h = jnp.maximum(h + b_in_ref[...], 0.0)

    # Hidden layers: Linear + ReLU (+ Dropout == identity in eval mode).
    # L is a static block dimension -> this Python loop is a static unroll.
    n_hidden = w_h_ref.shape[0]
    for l in range(n_hidden):
        acc = jnp.dot(h.astype(jnp.bfloat16), w_h_ref[l],
                      preferred_element_type=jnp.float32)
        h = jnp.maximum(acc + b_h_ref[l], 0.0)

    # Output layer: Linear, no activation.
    out = jnp.dot(h.astype(jnp.bfloat16), w_out_ref[...],
                  preferred_element_type=jnp.float32)
    o_ref[...] = (out + b_out_ref[...]).astype(o_ref.dtype)


def hourglass_mlp_streamed_kernel(x_ref, w_in_ref, b_in_ref, w_h_ref, b_h_ref,
                                  w_out_ref, b_out_ref, o_ref, h_ref):
    """2-D grid = (batch_tiles, hidden_layers).  One (H, H) hidden weight is
    streamed per grid step; the running activation `h` is carried in a bf16
    VMEM scratch across layer steps.

    SCRATCH-CARRY INVARIANT (do not break): the layer axis MUST be the last
    (fastest-varying) grid dimension and the l == 0 branch MUST fully
    overwrite h_ref; otherwise a stale activation from the previous batch
    tile would be read.
    """
    l = pl.program_id(1)
    n_layers = pl.num_programs(1)

    @pl.when(l == 0)
    def _input_layer():
        acc = jnp.dot(x_ref[...].astype(jnp.bfloat16), w_in_ref[...],
                      preferred_element_type=jnp.float32)
        h_ref[...] = jnp.maximum(acc + b_in_ref[...], 0.0).astype(h_ref.dtype)

    # Hidden layer `l` (w_h_ref holds only this layer's (H, H) weight).
    acc = jnp.dot(h_ref[...], w_h_ref[0], preferred_element_type=jnp.float32)
    h_ref[...] = jnp.maximum(acc + b_h_ref[0], 0.0).astype(h_ref.dtype)

    @pl.when(l == n_layers - 1)
    def _output_layer():
        out = jnp.dot(h_ref[...], w_out_ref[...],
                      preferred_element_type=jnp.float32)
        o_ref[...] = (out + b_out_ref[...]).astype(o_ref.dtype)


# ----------------------------------------------------------------------------
# Wrapper
# ----------------------------------------------------------------------------

def prepare_params(params):
    """One-time (out of hot path) weight preparation: bf16 cast of matmul
    operands, f32 biases, output columns padded to a multiple of 128 for
    lane-dense stores.  Cache and reuse the result across calls."""
    D_out = params["w_out"].shape[1]
    D_out_p = _round_up(D_out, 128)
    w_out = params["w_out"]
    b_out = params["b_out"]
    if D_out_p != D_out:
        w_out = jnp.pad(w_out, ((0, 0), (0, D_out_p - D_out)))
        b_out = jnp.pad(b_out, ((0, 0), (0, D_out_p - D_out)))
    return {
        "w_in": params["w_in"].astype(jnp.bfloat16),
        "b_in": params["b_in"].astype(jnp.float32),
        "w_h": params["w_h"].astype(jnp.bfloat16),
        "b_h": params["b_h"].astype(jnp.float32),
        "w_out": w_out.astype(jnp.bfloat16),
        "b_out": b_out.astype(jnp.float32),
        "d_out": int(D_out),
    }


def _vmem_need_resident(bt, d_in, h, n_layers, d_out_p):
    bf16, f32 = 2, 4
    # x2 everywhere: default double-buffered VMEM allocation (DMA still runs
    # once for grid-invariant blocks, but the second buffer is allocated).
    weights = 2 * ((d_in * h + n_layers * h * h + h * d_out_p) * bf16
                   + (h + n_layers * h + d_out_p) * f32)
    acts = 2 * bt * d_in * f32 + 2 * bt * d_out_p * f32 + 2 * bt * h * f32
    return weights + acts


def _vmem_need_streamed(bt, d_in, h, d_out_p):
    bf16, f32 = 2, 4
    weights_resident = 2 * ((d_in * h + h * d_out_p) * bf16
                            + (h + d_out_p) * f32)
    streamed = 2 * (h * h * bf16 + h * f32)          # w_h/b_h double-buffered
    acts = (2 * bt * d_in * f32 + 2 * bt * d_out_p * f32
            + bt * h * bf16)                          # x, out, h scratch
    return weights_resident + streamed + acts


def _vmem_budget(need_bytes, cap_bytes):
    # 2x compiler headroom, clamped to ~75% of physical per-core VMEM
    # (48 MiB on v7x's 64 MiB, 96 MiB on v5e/v6e's 128 MiB).
    return int(min(max(2 * need_bytes, 8 << 20), int(0.75 * cap_bytes)))


def hourglass_mlp(x, prepared, *, batch_tile=None):
    """Fused HourglassMLP forward (eval mode).

    x: (B, input_size) float32
    prepared: output of prepare_params()
    """
    B, D_in = x.shape
    H = prepared["w_in"].shape[1]
    L = prepared["w_h"].shape[0]
    D_out = prepared["d_out"]
    D_out_p = prepared["w_out"].shape[1]
    # TODO(synk): support hidden_layers == 0 (input_layer -> output_layer only)
    # if such configs ever appear.
    assert L >= 1, "hourglass_mlp kernel expects at least one hidden layer"

    vmem_cap = _tpu_vmem_capacity_bytes()

    # Batch-tile choice: big enough to clear each chip's machine balance
    # (>=512 on v6e/v5e's 128 MiB parts, 256-384 suffices on v7x thanks to its
    # higher HBM BW), rounded to 16 (bf16 sublane packing), and kept to >= 2
    # tiles when possible so the "parallel" axis can feed both v7x TCs.
    target = int(batch_tile) if batch_tile is not None else (
        512 if vmem_cap >= (96 << 20) else 384)
    half = _round_up(max((B + 1) // 2, 1), 16)
    bt = max(16, min(_round_up(target, 16), half))
    B_p = _round_up(B, bt)
    n_tiles = B_p // bt

    # Padded batch rows produce relu(bias)-style garbage by design; they are
    # sliced off below — never read them.
    x_p = x if B_p == B else jnp.pad(x, ((0, B_p - B), (0, 0)))

    flops = 2 * B_p * (D_in * H + L * H * H + H * D_out_p)
    w_bytes_once = (D_in * H + L * H * H + H * D_out_p) * 2 \
        + (H + L * H + D_out_p) * 4
    io_bytes = B_p * D_in * 4 + B_p * D_out_p * 4

    # Resident vs streamed: keep the whole hidden-weight stack in VMEM when it
    # comfortably fits this chip's budget; otherwise stream one layer per step.
    need_res = _vmem_need_resident(bt, D_in, H, L, D_out_p)
    use_resident = (2 * need_res) <= int(0.5 * vmem_cap)

    if use_resident:
        out = pl.pallas_call(
            hourglass_mlp_resident_kernel,
            out_shape=jax.ShapeDtypeStruct((B_p, D_out_p), x.dtype),
            grid_spec=pltpu.PrefetchScalarGridSpec(
                num_scalar_prefetch=0,
                grid=(n_tiles,),
                in_specs=[
                    pl.BlockSpec((bt, D_in), lambda i: (i, 0)),      # x (f32)
                    pl.BlockSpec((D_in, H), lambda i: (0, 0)),       # w_in
                    pl.BlockSpec((1, H), lambda i: (0, 0)),          # b_in
                    pl.BlockSpec((L, H, H), lambda i: (0, 0, 0)),    # w_h (all)
                    pl.BlockSpec((L, 1, H), lambda i: (0, 0, 0)),    # b_h (all)
                    pl.BlockSpec((H, D_out_p), lambda i: (0, 0)),    # w_out
                    pl.BlockSpec((1, D_out_p), lambda i: (0, 0)),    # b_out
                ],
                out_specs=pl.BlockSpec((bt, D_out_p), lambda i: (i, 0)),
            ),
            compiler_params=pltpu.CompilerParams(
                dimension_semantics=("parallel",),
                vmem_limit_bytes=_vmem_budget(need_res, vmem_cap),
            ),
            cost_estimate=pl.CostEstimate(
                flops=flops, transcendentals=0,
                bytes_accessed=io_bytes + w_bytes_once),   # weights read once
        )(x_p, prepared["w_in"], prepared["b_in"], prepared["w_h"],
          prepared["b_h"], prepared["w_out"], prepared["b_out"])
    else:
        need_str = _vmem_need_streamed(bt, D_in, H, D_out_p)
        # Streamed w_h/b_h are re-DMA'd once per batch tile.
        w_bytes_streamed = ((D_in * H + H * D_out_p) * 2
                            + (H + D_out_p) * 4
                            + n_tiles * (L * H * H * 2 + L * H * 4))
        out = pl.pallas_call(
            hourglass_mlp_streamed_kernel,
            out_shape=jax.ShapeDtypeStruct((B_p, D_out_p), x.dtype),
            grid_spec=pltpu.PrefetchScalarGridSpec(
                num_scalar_prefetch=0,
                # Layer axis LAST (fastest) — required by the h_ref carry.
                grid=(n_tiles, L),
                in_specs=[
                    pl.BlockSpec((bt, D_in), lambda i, l: (i, 0)),    # x (f32)
                    pl.BlockSpec((D_in, H), lambda i, l: (0, 0)),     # w_in
                    pl.BlockSpec((1, H), lambda i, l: (0, 0)),        # b_in
                    pl.BlockSpec((1, H, H), lambda i, l: (l, 0, 0)),  # w_h[l]
                    pl.BlockSpec((1, 1, H), lambda i, l: (l, 0, 0)),  # b_h[l]
                    pl.BlockSpec((H, D_out_p), lambda i, l: (0, 0)),  # w_out
                    pl.BlockSpec((1, D_out_p), lambda i, l: (0, 0)),  # b_out
                ],
                out_specs=pl.BlockSpec((bt, D_out_p), lambda i, l: (i, 0)),
                scratch_shapes=[pltpu.VMEM((bt, H), jnp.bfloat16)],   # carried h
            ),
            compiler_params=pltpu.CompilerParams(
                dimension_semantics=("parallel", "arbitrary"),
                vmem_limit_bytes=_vmem_budget(need_str, vmem_cap),
            ),
            cost_estimate=pl.CostEstimate(
                flops=flops, transcendentals=0,
                bytes_accessed=io_bytes + w_bytes_streamed),
        )(x_p, prepared["w_in"], prepared["b_in"], prepared["w_h"],
          prepared["b_h"], prepared["w_out"], prepared["b_out"])

    return out[:B, :D_out]


# ----------------------------------------------------------------------------
# Init + pure-JAX reference
# ----------------------------------------------------------------------------

def init_params(key, input_size, hidden_size_fac, hidden_layers, output_size):
    """Deterministic parameter init (PyTorch-style uniform ranges), f32."""
    hidden_size = int(input_size * hidden_size_fac)
    keys = jax.random.split(key, 6)

    def lin_init(kw, kb, fan_in, fan_out):
        bound = 1.0 / jnp.sqrt(fan_in)
        w = jax.random.uniform(kw, (fan_in, fan_out), jnp.float32, -bound, bound)
        b = jax.random.uniform(kb, (1, fan_out), jnp.float32, -bound, bound)
        return w, b

    w_in, b_in = lin_init(keys[0], keys[1], input_size, hidden_size)

    bound_h = 1.0 / jnp.sqrt(hidden_size)
    w_h = jax.random.uniform(keys[2], (hidden_layers, hidden_size, hidden_size),
                             jnp.float32, -bound_h, bound_h)
    b_h = jax.random.uniform(keys[3], (hidden_layers, 1, hidden_size),
                             jnp.float32, -bound_h, bound_h)

    w_out, b_out = lin_init(keys[4], keys[5], hidden_size, output_size)
    return {"w_in": w_in, "b_in": b_in, "w_h": w_h, "b_h": b_h,
            "w_out": w_out, "b_out": b_out}


def hourglass_mlp_ref(x, params):
    """Pure-JAX reference mirroring the kernel's bf16-matmul / f32-accumulate
    numerics (dropout = identity in eval mode)."""
    bf16 = jnp.bfloat16

    def mm(a, w):
        return jnp.dot(a.astype(bf16), w.astype(bf16),
                       preferred_element_type=jnp.float32)

    h = jnp.maximum(mm(x, params["w_in"]) + params["b_in"], 0.0)
    for i in range(params["w_h"].shape[0]):
        h = jnp.maximum(mm(h, params["w_h"][i]) + params["b_h"][i], 0.0)
    return mm(h, params["w_out"]) + params["b_out"]


if __name__ == "__main__":
    # HourglassMLP(input_size=256, hidden_size_fac=0.5, hidden_layers=2,
    #              output_size=64, dropout=0.1) in eval mode.
    input_size, hidden_size_fac, hidden_layers, output_size = 256, 0.5, 2, 64
    batch = 512   # -> 2 batch tiles of 256, both v7x TensorCores get work.

    key = jax.random.PRNGKey(0)
    kx, kp = jax.random.split(key)
    x = jax.random.normal(kx, (batch, input_size), jnp.float32)
    params = init_params(kp, input_size, hidden_size_fac, hidden_layers,
                         output_size)

    prepared = prepare_params(params)   # one-time weight cast/pad (cache this)
    out = jax.block_until_ready(hourglass_mlp(x, prepared))
    ref = hourglass_mlp_ref(x, params)

    assert out.shape == (batch, output_size)
    assert jnp.allclose(out, ref, atol=1e-2, rtol=1e-2), "mismatch vs reference"

    print("KERNEL_OK")
</pallas_src>

<mosaic_0001>
module attributes {stable_mosaic.version = 11 : i64} {
  func.func @hourglass_mlp_resident_kernel(%arg0: i32, %arg1: memref<256x256xf32, #tpu.memory_space<vmem>>, %arg2: memref<256x128xbf16, #tpu.memory_space<vmem>>, %arg3: memref<1x128xf32, #tpu.memory_space<vmem>>, %arg4: memref<2x128x128xbf16, #tpu.memory_space<vmem>>, %arg5: memref<2x1x128xf32, #tpu.memory_space<vmem>>, %arg6: memref<128x128xbf16, #tpu.memory_space<vmem>>, %arg7: memref<1x128xf32, #tpu.memory_space<vmem>>, %arg8: memref<256x128xf32, #tpu.memory_space<vmem>>) attributes {dimension_semantics = [#tpu.dimension_semantics<parallel>], iteration_bounds = array<i64: 2>, scalar_prefetch = 0 : i64, scratch_operands = 0 : i64, tpu.core_type = #tpu.core_type<tc>, window_params = [{transform_indices = @transform_0, window_bounds = array<i64: 256, 256>}, {pipeline_mode = #tpu.pipeline_mode<synchronous>, transform_indices = @transform_1, window_bounds = array<i64: 256, 128>}, {pipeline_mode = #tpu.pipeline_mode<synchronous>, transform_indices = @transform_2, window_bounds = array<i64: 1, 128>}, {pipeline_mode = #tpu.pipeline_mode<synchronous>, transform_indices = @transform_3, window_bounds = array<i64: 2, 128, 128>}, {pipeline_mode = #tpu.pipeline_mode<synchronous>, transform_indices = @transform_4, window_bounds = array<i64: 2, 1, 128>}, {pipeline_mode = #tpu.pipeline_mode<synchronous>, transform_indices = @transform_5, window_bounds = array<i64: 128, 128>}, {pipeline_mode = #tpu.pipeline_mode<synchronous>, transform_indices = @transform_6, window_bounds = array<i64: 1, 128>}, {transform_indices = @transform_7, window_bounds = array<i64: 256, 128>}]} {
    %c0 = arith.constant 0 : index
    %c0_0 = arith.constant 0 : index
    %0 = vector.load %arg1[%c0, %c0_0] : memref<256x256xf32, #tpu.memory_space<vmem>>, vector<256x256xf32>
    %1 = arith.truncf %0 : vector<256x256xf32> to vector<256x256xbf16>
    %c0_1 = arith.constant 0 : index
    %c0_2 = arith.constant 0 : index
    %2 = vector.load %arg2[%c0_1, %c0_2] : memref<256x128xbf16, #tpu.memory_space<vmem>>, vector<256x128xbf16>
    %cst = arith.constant dense<0.000000e+00> : vector<256x128xf32>
    %3 = tpu.matmul %1, %2, %cst {dimension_numbers = #tpu.dot_dimension_numbers<[1], [0], [0], [1], [0, 0, 1, 1], [], []>} : vector<256x256xbf16>, vector<256x128xbf16>, vector<256x128xf32> -> vector<256x128xf32>
    %c0_3 = arith.constant 0 : index
    %c0_4 = arith.constant 0 : index
    %4 = vector.load %arg3[%c0_3, %c0_4] : memref<1x128xf32, #tpu.memory_space<vmem>>, vector<1x128xf32>
    %5 = vector.broadcast %4 : vector<1x128xf32> to vector<256x128xf32>
    %6 = arith.addf %3, %5 : vector<256x128xf32>
    %cst_5 = arith.constant 0.000000e+00 : f32
    %7 = vector.broadcast %cst_5 : f32 to vector<256x128xf32>
    %8 = arith.maximumf %6, %7 : vector<256x128xf32>
    %9 = arith.truncf %8 : vector<256x128xf32> to vector<256x128xbf16>
    %c0_6 = arith.constant 0 : index
    %c0_7 = arith.constant 0 : index
    %c0_8 = arith.constant 0 : index
    %10 = vector.load %arg4[%c0_6, %c0_7, %c0_8] : memref<2x128x128xbf16, #tpu.memory_space<vmem>>, vector<1x128x128xbf16>
    %11 = vector.shape_cast %10 : vector<1x128x128xbf16> to vector<128x128xbf16>
    %cst_9 = arith.constant dense<0.000000e+00> : vector<256x128xf32>
    %12 = tpu.matmul %9, %11, %cst_9 {dimension_numbers = #tpu.dot_dimension_numbers<[1], [0], [0], [1], [0, 0, 1, 1], [], []>} : vector<256x128xbf16>, vector<128x128xbf16>, vector<256x128xf32> -> vector<256x128xf32>
    %c0_10 = arith.constant 0 : index
    %c0_11 = arith.constant 0 : index
    %c0_12 = arith.constant 0 : index
    %13 = vector.load %arg5[%c0_10, %c0_11, %c0_12] : memref<2x1x128xf32, #tpu.memory_space<vmem>>, vector<1x1x128xf32>
    %14 = vector.shape_cast %13 : vector<1x1x128xf32> to vector<1x128xf32>
    %15 = vector.broadcast %14 : vector<1x128xf32> to vector<256x128xf32>
    %16 = arith.addf %12, %15 : vector<256x128xf32>
    %cst_13 = arith.constant 0.000000e+00 : f32
    %17 = vector.broadcast %cst_13 : f32 to vector<256x128xf32>
    %18 = arith.maximumf %16, %17 : vector<256x128xf32>
    %19 = arith.truncf %18 : vector<256x128xf32> to vector<256x128xbf16>
    %c1 = arith.constant 1 : index
    %c0_14 = arith.constant 0 : index
    %c0_15 = arith.constant 0 : index
    %20 = vector.load %arg4[%c1, %c0_14, %c0_15] : memref<2x128x128xbf16, #tpu.memory_space<vmem>>, vector<1x128x128xbf16>
    %21 = vector.shape_cast %20 : vector<1x128x128xbf16> to vector<128x128xbf16>
    %cst_16 = arith.constant dense<0.000000e+00> : vector<256x128xf32>
    %22 = tpu.matmul %19, %21, %cst_16 {dimension_numbers = #tpu.dot_dimension_numbers<[1], [0], [0], [1], [0, 0, 1, 1], [], []>} : vector<256x128xbf16>, vector<128x128xbf16>, vector<256x128xf32> -> vector<256x128xf32>
    %c1_17 = arith.constant 1 : index
    %c0_18 = arith.constant 0 : index
    %c0_19 = arith.constant 0 : index
    %23 = vector.load %arg5[%c1_17, %c0_18, %c0_19] : memref<2x1x128xf32, #tpu.memory_space<vmem>>, vector<1x1x128xf32>
    %24 = vector.shape_cast %23 : vector<1x1x128xf32> to vector<1x128xf32>
    %25 = vector.broadcast %24 : vector<1x128xf32> to vector<256x128xf32>
    %26 = arith.addf %22, %25 : vector<256x128xf32>
    %cst_20 = arith.constant 0.000000e+00 : f32
    %27 = vector.broadcast %cst_20 : f32 to vector<256x128xf32>
    %28 = arith.maximumf %26, %27 : vector<256x128xf32>
    %29 = arith.truncf %28 : vector<256x128xf32> to vector<256x128xbf16>
    %c0_21 = arith.constant 0 : index
    %c0_22 = arith.constant 0 : index
    %30 = vector.load %arg6[%c0_21, %c0_22] : memref<128x128xbf16, #tpu.memory_space<vmem>>, vector<128x128xbf16>
    %cst_23 = arith.constant dense<0.000000e+00> : vector<256x128xf32>
    %31 = tpu.matmul %29, %30, %cst_23 {dimension_numbers = #tpu.dot_dimension_numbers<[1], [0], [0], [1], [0, 0, 1, 1], [], []>} : vector<256x128xbf16>, vector<128x128xbf16>, vector<256x128xf32> -> vector<256x128xf32>
    %c0_24 = arith.constant 0 : index
    %c0_25 = arith.constant 0 : index
    %32 = vector.load %arg7[%c0_24, %c0_25] : memref<1x128xf32, #tpu.memory_space<vmem>>, vector<1x128xf32>
    %33 = vector.broadcast %32 : vector<1x128xf32> to vector<256x128xf32>
    %34 = arith.addf %31, %33 : vector<256x128xf32>
    %c0_26 = arith.constant 0 : index
    %c0_27 = arith.constant 0 : index
    %35 = vector.load %arg8[%c0_26, %c0_27] : memref<256x128xf32, #tpu.memory_space<vmem>>, vector<256x128xf32>
    tpu.vector_store %arg8[%c0_26, %c0_27], %34 {strides = array<i32>} : memref<256x128xf32, #tpu.memory_space<vmem>>, vector<256x128xf32>,
    return
  }
  func.func @transform_0(%arg0: i32) -> (i32, i32) {
    %c0_i32 = arith.constant 0 : i32
    %c0_i32_0 = arith.constant 0 : i32
    return %arg0, %c0_i32 : i32, i32
  }
  func.func @transform_1(%arg0: i32) -> (i32, i32) {
    %c0_i32 = arith.constant 0 : i32
    %c0_i32_0 = arith.constant 0 : i32
    %c0_i32_1 = arith.constant 0 : i32
    return %c0_i32, %c0_i32_0 : i32, i32
  }
  func.func @transform_2(%arg0: i32) -> (i32, i32) {
    %c0_i32 = arith.constant 0 : i32
    %c0_i32_0 = arith.constant 0 : i32
    %c0_i32_1 = arith.constant 0 : i32
    return %c0_i32, %c0_i32_0 : i32, i32
  }
  func.func @transform_3(%arg0: i32) -> (i32, i32, i32) {
    %c0_i32 = arith.constant 0 : i32
    %c0_i32_0 = arith.constant 0 : i32
    %c0_i32_1 = arith.constant 0 : i32
    %c0_i32_2 = arith.constant 0 : i32
    return %c0_i32, %c0_i32_0, %c0_i32_1 : i32, i32, i32
  }
  func.func @transform_4(%arg0: i32) -> (i32, i32, i32) {
    %c0_i32 = arith.constant 0 : i32
    %c0_i32_0 = arith.constant 0 : i32
    %c0_i32_1 = arith.constant 0 : i32
    %c0_i32_2 = arith.constant 0 : i32
    return %c0_i32, %c0_i32_0, %c0_i32_1 : i32, i32, i32
  }
  func.func @transform_5(%arg0: i32) -> (i32, i32) {
    %c0_i32 = arith.constant 0 : i32
    %c0_i32_0 = arith.constant 0 : i32
    %c0_i32_1 = arith.constant 0 : i32
    return %c0_i32, %c0_i32_0 : i32, i32
  }
  func.func @transform_6(%arg0: i32) -> (i32, i32) {
    %c0_i32 = arith.constant 0 : i32
    %c0_i32_0 = arith.constant 0 : i32
    %c0_i32_1 = arith.constant 0 : i32
    return %c0_i32, %c0_i32_0 : i32, i32
  }
  func.func @transform_7(%arg0: i32) -> (i32, i32) {
    %c0_i32 = arith.constant 0 : i32
    %c0_i32_0 = arith.constant 0 : i32
    return %arg0, %c0_i32 : i32, i32
  }
}

</mosaic_0001>

<bundles_post_ra>
// kernel: tpu_custom_call.1
= control target key start
LH: loop header
LB: loop body
LE: loop exit
PB: predicated region body
PF: predicated region fallthrough
CT: control target
= control target key end

     0   :  { %s2965_s0 = inlined_call_operand.hbm [shape: f32[512,256], index: 0, kind: input, shape index: {}]   ;;  %s2966_s1 = inlined_call_operand.hbm [shape: bf16[256,128], index: 1, kind: input, shape index: {}]   ;;  %s2967_s2 = inlined_call_operand.vmem [shape: f32[1,128], index: 2, kind: input, shape index: {}]   ;;  %s2968_s3 = inlined_call_operand.hbm [shape: bf16[2,128,128], index: 3, kind: input, shape index: {}]   ;;  %s2969_s4 = inlined_call_operand.vmem [shape: f32[2,1,128], index: 4, kind: input, shape index: {}]   ;;  %s2970_s5 = inlined_call_operand.hbm [shape: bf16[128,128], index: 5, kind: input, shape index: {}]   ;;  %s2971_s6 = inlined_call_operand.vmem [shape: f32[1,128], index: 6, kind: input, shape index: {}]   ;;  %s2972_s7 = inlined_call_operand.hbm [shape: f32[512,128], index: 7, kind: output, shape index: {}]  }
   0x1   :  { %2977 = sst [smem:[#allocation15_spill]] %s2966_s1 }
   0x2   :  { %12 = vsyncpa [#allocation3], 0 }
   0x3   :  { %14 = vsyncpa [#allocation3 + $0x1], 0 }
   0x4   :  { %15 = vsyncpa [#allocation6], 0 }
   0x5   :  { %16 = vsyncpa [#allocation9], 0 }
   0x6   :  { %17 = vsyncpa [#allocation4], 0 }
   0x7   :  { %19 = vsyncpa [#allocation4 + $0x1], 0  ;;  %s2494_s24 = smov 0   ;;  %s2496_s25 = smov 0  }
   0x8   :  { %s2498_s26 = smov 0   ;;  %s2500_s27 = smov 0  }
   0x9 LB: > { %s2515_s28 = sadd.s32 4294967295, %s2441_s27   ;;  %s1727_s29 = sadd.s32 4294967294, %s2441_s27   ;;  %s2441_s27 = sphi %s2500_s27, %s2998_s27   ;;  %s2437_s26 = sphi %s2498_s26, %s2997_s26   ;;  %s2433_s25 = sphi %s2496_s25, %s2996_s25   ;;  %s2429_s24 = sphi %s2494_s24, %s2995_s24  }
   0xa   : > { %p45_p0 = scmp.ne.s32.totalorder %s2433_s25, %s2429_s24  ;;  %p2973_p1 = scmp.eq.s32.totalorder %s2515_s28, 0 }
   0xb   : > { %p201_p3 = scmp.eq.s32.totalorder %s1727_s29, 1  ;;  %p1728_p5 = scmp.ge.s32.totalorder %s2441_s27, 1 }
   0xc   : > { %p2524_p4 = por %p2973_p1, %p45_p0  ;;  %p208_p7 = scmp.lt.s32.totalorder %s2441_s27, 3 }
   0xd   : > { %p2529_p6 = por %p201_p3, %p45_p0  ;;  %s2443_s10 = smov [#allocation5]  }
   0xe   : > { %s2978_s30 = scalar_select %p2524_p4, 1, 0 }
   0xf   : > { %s2979_s8 = scalar_select %p2529_p6, 1, 0 }
  0x10   : > { %p2534_p8 = pnand %p1728_p5, %p208_p7  ;;  %s220_s11 = sshll.u32 %s2443_s10, 4  ;;  %s221_s11 = int_to_ptr.vmem [resolvable:$true] %s220_s11 }
  0x11   : > { %s2444_s13 = smov [#allocation7]   ;;  %s2445_s15 = smov [#allocation8]  }
  0x12   : > { %s2980_s9 = scalar_select %p2534_p8, 1, 0 }
  0x13   : > { %p2156_p9 = pneg %p2534_p8  ;;  %s236_s14 = sshll.u32 %s2444_s13, 4  ;;  %s237_s14 = int_to_ptr.vmem [resolvable:$true] %s236_s14 }
  0x14   : > { %s252_s16 = sshll.u32 %s2445_s15, 4  ;;  %s2274_s17 = scalar_lea.vmem %s221_s11, 2048  ;;  %s253_s16 = int_to_ptr.vmem [resolvable:$true] %s252_s16 }
  0x15   : > { %p2543_p11 = pnand %p2156_p9, %p2973_p1  ;;  %p2275_p13 = scmp.ne.s32.totalorder %s221_s11, %s2274_s17 }
  0x16   : > { %p2282_p5 = scmp.lt.s32.totalorder %s221_s11, %s221_s11  ;;  %p2283_p7 = scmp.lt.s32.totalorder %s2274_s17, %s2274_s17 }
  0x17   : > { %p2265_p12 = pneg %p2543_p11 }
  0x18   : > { %p2284_p9 = por %p2283_p7, %p2282_p5 }
  0x19   : > { %p2277_p0 = pnand %p2275_p13, %p2265_p12 }
  0x1b   : > { %p2278_p3 = pneg %p2277_p0 }
  0x1d   : > { %p2285_p10 = pnand %p2284_p9, %p2278_p3 }
  0x1f   : > { %2288 = shalt.err (!%p2285_p10)
}
  0x20   : > { %s2446_s18 = smov 64   ;;  %s2447_s19 = smov 4  }
  0x21   : > { %s2982_s1 = sld [smem:[#allocation15_spill]]  ;;  %s2300_s22 = scalar_lea.vmem %s237_s14, 2048 }
  0x22   : > { %p2301_p1 = scmp.ne.s32.totalorder %s237_s14, %s2300_s22  ;;  %p2308_p2 = scmp.lt.s32.totalorder %s237_s14, %s237_s14 }
  0x23   : > { %p2309_p6 = scmp.lt.s32.totalorder %s2300_s22, %s2300_s22 }
  0x24   : > { %p2303_p13 = pnand %p2301_p1, %p2265_p12 }
  0x25   : > { %p2310_p5 = por %p2309_p6, %p2308_p2 }
  0x26   : > { %p2304_p0 = pneg %p2303_p13 }
  0x27   : > { %2159 = dma.hbm_to_vmem [thread:$0]  (!%p2543_p11), %s2982_s1, 2048, %s221_s11, [#allocation6], %s2446_s18, %s2446_s18, %s2447_s19  }
  0x28   : > { %p2311_p3 = pnand %p2310_p5, %p2304_p0 }
  0x2a   : > { %2314 = shalt.err (!%p2311_p3)
}
  0x2b   : > { %2162 = dma.hbm_to_vmem [thread:$0]  (!%p2543_p11), %s2968_s3, 2048, %s237_s14, [#allocation6], %s2446_s18, %s2446_s18, %s2447_s19  }
  0x2c   : > { %s2326_s10 = scalar_lea.vmem %s253_s16, 1024  ;;  %p2334_p9 = scmp.lt.s32.totalorder %s253_s16, %s253_s16 }
  0x2d   : > { %p2327_p10 = scmp.ne.s32.totalorder %s253_s16, %s2326_s10  ;;  %p2335_p13 = scmp.lt.s32.totalorder %s2326_s10, %s2326_s10 }
  0x2f   : > { %p2329_p7 = pnand %p2327_p10, %p2265_p12  ;;  %p2336_p4 = por %p2335_p13, %p2334_p9 }
  0x31   : > { %p2330_p1 = pneg %p2329_p7 }
  0x33   : > { %p2337_p2 = pnand %p2336_p4, %p2330_p1 }
  0x35   : > { %2340 = shalt.err (!%p2337_p2)
}
  0x36   : > { %2165 = dma.hbm_to_vmem [thread:$0]  (!%p2543_p11), %s2970_s5, 1024, %s253_s16, [#allocation9], %s2446_s18, %s2446_s18, %s2447_s19  }
  0x37   : > { %s2574_s14 = sadd.s32 1, %s2441_s27   ;;  %s32_s12 = sadd.s32 1, %s2437_s26 }
  0x38   : > { %s29_s15 = ssub.s32 %s2441_s27, %s2574_s14  ;;  %p39_p6 = scmp.ne.s32.totalorder %s2437_s26, %s2433_s25 }
  0x39   : > { %p30_p4 = scmp.eq.s32.totalorder %s29_s15, 0  ;;  %p40_p12 = scmp.eq.s32.totalorder %s2441_s27, 0 }
  0x3a   : > { %p2177_p0 = scmp.lt.s32.totalorder %s2441_s27, 2  ;;  %p2983_p3 = scmp.eq.s32.totalorder %s2515_s28, 1 }
  0x3b   : > { %s2584_s17 = scalar_select %p30_p4, %s2437_s26, %s32_s12  }
  0x3c   : > { %p41_p5 = por %p40_p12, %p39_p6  ;;  %p2588_p10 = por %p2983_p3, %p39_p6 }
  0x3d   : > { %s269_s21 = sand.u32 1, %s2437_s26   ;;  %s1794_s22 = sshll.u32 %s2441_s27, 13 }
  0x3e   : > { %s2984_s20 = scalar_select %p2588_p10, 1, 0 }
  0x3f   : > { %s1733_s16 = sshll.u32 %s269_s21, 9  ;;  %s2597_s23 = scalar_lea.hbm %s2965_s0, %s1794_s22 }
  0x40   : > { %s273_s29 = scalar_lea.vmem [#allocation2], %s1733_s16  ;;  %p2599_p11 = pnand %p2177_p0, %p41_p5 }
  0x41   : > { %s281_s10 = sshll.u32 %s273_s29, 4  ;;  %s2605_s13 = scalar_lea.sflag [#allocation3], %s269_s21  ;;  %s2603_s10 = int_to_ptr.vmem [resolvable:$true] %s281_s10 }
  0x42   : > { %s2341_s15 = scalar_lea.hbm %s2597_s23, 8192  ;;  %p2343_p1 = pneg %p2599_p11 }
  0x43   : > { %p2342_p7 = scmp.ne.s32.totalorder %s2597_s23, %s2341_s15  ;;  %s2346_s16 = scalar_lea.hbm %s2965_s0, 16384 }
  0x44   : > { %p2347_p2 = scmp.lt.s32.totalorder %s2597_s23, %s2965_s0  ;;  %p2348_p4 = scmp.lt.s32.totalorder %s2346_s16, %s2341_s15 }
  0x45   : > { %p2344_p9 = pnand %p2343_p1, %p2342_p7 }
  0x46   : > { %p2349_p6 = por %p2348_p4, %p2347_p2 }
  0x47   : > { %p2345_p13 = pneg %p2344_p9 }
  0x49   : > { %p2350_p12 = pnand %p2349_p6, %p2345_p13 }
  0x4b   : > { %2353 = shalt.err (!%p2350_p12)
}
  0x4c   : > { %s2354_s21 = scalar_lea.vmem %s2603_s10, 8192  ;;  %s2448_s29 = smov [#allocation2]  }
  0x4d   : > { %p2355_p0 = scmp.ne.s32.totalorder %s2603_s10, %s2354_s21  ;;  %s2359_s1 = sshll.u32 %s2448_s29, 4  ;;  %s2360_s1 = int_to_ptr.vmem [resolvable:$false] %s2359_s1 }
  0x4e   : > { %s2361_s12 = scalar_lea.vmem %s2360_s1, 16384  ;;  %p2362_p7 = scmp.lt.s32.totalorder %s2603_s10, %s2360_s1 }
  0x4f   : > { %p2357_p5 = pnand %p2355_p0, %p2343_p1  ;;  %p2363_p9 = scmp.lt.s32.totalorder %s2361_s12, %s2354_s21 }
  0x51   : > { %p2358_p3 = pneg %p2357_p5  ;;  %p2364_p10 = por %p2363_p9, %p2362_p7 }
  0x53   : > { %p2365_p8 = pnand %p2364_p10, %p2358_p3 }
  0x55   : > { %2368 = shalt.err (!%p2365_p8)
}
  0x56   : > { %s2449_s15 = smov 256   ;;  %s2450_s22 = smov 16  }
  0x57   : > { %2169 = dma.hbm_to_vmem [thread:$0]  (!%p2599_p11), %s2597_s23, 8192, %s2603_s10, %s2605_s13, %s2449_s15, %s2449_s15, %s2450_s22  }
  0x58   : > { %p2986_p1 = scmp.ne.s32.totalorder %s2980_s9, 0 }
  0x59   : > { %s2629_s16 = sand.u32 (!%p2986_p1), 1, %s2433_s25   ;;  %p2987_p8 = scmp.ne.s32.totalorder (!%p2986_p1), %s2978_s30, 0 }
  0x5a   : > { %293 = sbr.rel (%p2986_p1) target bundleno = 1073 (0x431), region = 48  ;;  %s1738_s1 = sshll.u32 (!%p2986_p1), %s2629_s16, 9 }
  0x5b   : > { %s296_s18 = scalar_lea.sflag (!%p2986_p1), [#allocation3], %s2629_s16  ;;  %s2633_s19 = scalar_lea.vmem (!%p2986_p1), [#allocation2], %s1738_s1 }
  0x5f   : > { %2412 = dma.done.wait (%p2987_p8), %s296_s18, 8192  }
  0x60   : > { %2414 = vsyncadd (%p2987_p8), %s296_s18, 4294959104  ;;  %p2988_p10 = scmp.eq.s32.totalorder %s2515_s28, 0 }
  0x62   : > { %2416 = dma.done.wait (%p2988_p10), [#allocation6], 4096   ;;  %p2989_p11 = pmov %p2988_p10 }
  0x63   : > { %p2990_p13 = pmov %p2988_p10 }
  0x64   : > { %2418 = vsyncadd (%p2989_p11), [#allocation6], 4294963200 }
  0x65   : > { %2420 = dma.done.wait (%p2990_p13), [#allocation9], 1024   ;;  %p2991_p2 = pmov %p2988_p10 }
  0x66   : > { %v2223_v0 = vld [vmem:[#allocation5 + $0x78] sm:$0xff]   ;;  %v2225_v2 = vld [vmem:[#allocation5 + $0x70] sm:$0xff]   ;;  %v2227_v4 = vld [vmem:[#allocation5 + $0x68] sm:$0xff]   ;;  %s1742_s21 = sshll.u32 %s2629_s16, 8  ;;  %s1795_s22 = sshll.u32 %s2515_s28, 12 }
  0x67   : > { %2422 = vsyncadd (%p2991_p2), [#allocation9], 4294966272  ;;  %v2224_v1 = vld [vmem:[#allocation5 + $0x38] sm:$0xff]   ;;  %1796 = vmatprep.subr.bf16.mxu0 %v2223_v0  ;;  %2124 = vmatprep.subr.bf16.mxu1 %v2223_v0  ;;  %v2226_v3 = vld [vmem:[#allocation5 + $0x30] sm:$0xff]   ;;  %s2850_s15 = scalar_lea.vmem [#allocation10], %s1742_s21  ;;  %s2917_s30 = scalar_lea.hbm %s2972_s7, %s1795_s22 }
  0x68   : > { %1797 = vmatpush3.bf16.msra.mxu0 %v2224_v1  ;;  %2132 = vmatpush3.bf16.msra.mxu1 %v2224_v1  ;;  %v2228_v5 = vld [vmem:[#allocation5 + $0x28] sm:$0xff]   ;;  %v2229_v6 = vld [vmem:[#allocation5 + $0x60] sm:$0xff]   ;;  %v2231_v8 = vld [vmem:[#allocation5 + $0x58] sm:$0xff]   ;;  %s1625_s1 = sshll.u32 %s2850_s15, 4  ;;  %s1612_s28 = scalar_lea.sflag [#allocation4], %s2629_s16  ;;  %s2919_s1 = int_to_ptr.vmem [resolvable:$true] %s1625_s1 }
  0x69   : > { %1798 = vmatprep.subr.bf16.mxu0 %v2225_v2  ;;  %2125 = vmatprep.subr.bf16.mxu1 %v2225_v2  ;;  %v2230_v7 = vld [vmem:[#allocation5 + $0x20] sm:$0xff]   ;;  %v2232_v9 = vld [vmem:[#allocation5 + $0x18] sm:$0xff]   ;;  %v2233_v10 = vld [vmem:[#allocation5 + $0x50] sm:$0xff]   ;;  %s2369_s9 = scalar_lea.vmem %s2919_s1, 4096  ;;  %p2992_p6 = scmp.ne.s32.totalorder %s2984_s20, 0 }
  0x6a   : > { %v346_v11 = vld [vmem:[%s2633_s19 + $0x8] sm:$0xff]  ;;  %v348_v12 = vld [vmem:[%s2633_s19 + $0x18] sm:$0xff]  ;;  %v2234_v14 = vld [vmem:[#allocation5 + $0x10] sm:$0xff]   ;;  %p2370_p4 = scmp.ne.s32.totalorder %s2919_s1, %s2369_s9  ;;  %s2451_s23 = smov [#allocation10]  }
  0x6b   : > { %v410_v13 = vpack.c.bf16 %v348_v12, %v346_v11  ;;  %v2235_v15 = vld [vmem:[#allocation5 + $0x48] sm:$0xff]   ;;  %v2237_v17 = vld [vmem:[#allocation5 + $0x40] sm:$0xff]   ;;  %v347_v20 = vld [vmem:[%s2633_s19 + $0x10] sm:$0xff]  ;;  %s2373_s10 = sshll.u32 %s2451_s23, 4  ;;  %s2374_s10 = int_to_ptr.vmem [resolvable:$false] %s2373_s10 }
  0x6c   : > { %1799 = vmatpush3.bf16.msra.mxu0 %v2226_v3  ;;  %2133 = vmatpush3.bf16.msra.mxu1 %v2226_v3  ;;  %v2236_v16 = vld [vmem:[#allocation5 + $0x8] sm:$0xff]   ;;  %v2238_v18 = vld [vmem:[#allocation5] sm:$0xff]   ;;  %v352_v22 = vld [vmem:[%s2633_s19 + $0x38] sm:$0xff]  ;;  %p2371_p12 = pnand %p2370_p4, %p2992_p6  ;;  %s2375_s11 = scalar_lea.vmem %s2374_s10, 8192 }
  0x6d   : > { %1800 = vmatprep.subr.bf16.mxu0 %v2227_v4  ;;  %2126 = vmatprep.subr.bf16.mxu1 %v2227_v4  ;;  %v345_v19 = vld [vmem:[%s2633_s19] sm:$0xff]  ;;  %v350_v21 = vld [vmem:[%s2633_s19 + $0x28] sm:$0xff]  ;;  %v396_v24 = vld [vmem:[%s2633_s19 + $0x198] sm:$0xff]  ;;  %p2376_p5 = scmp.lt.s32.totalorder %s2919_s1, %s2374_s10  ;;  %p2377_p3 = scmp.lt.s32.totalorder %s2375_s11, %s2369_s9 }
  0x6e   : > { %608 = vmatprep.mubr.bf16.mxu0 %v410_v13  ;;  %v394_v23 = vld [vmem:[%s2633_s19 + $0x188] sm:$0xff]  ;;  %v409_v25 = vpack.c.bf16 %v347_v20, %v345_v19  ;;  %v393_v27 = vld [vmem:[%s2633_s19 + $0x180] sm:$0xff]  ;;  %v395_v28 = vld [vmem:[%s2633_s19 + $0x190] sm:$0xff]  ;;  %v412_v29 = vpack.c.bf16 %v352_v22, %v350_v21  ;;  %p2372_p0 = pneg %p2371_p12 }
  0x6f   : > { %v434_v26 = vpack.c.bf16 %v396_v24, %v394_v23  ;;  %v433_v30 = vpack.c.bf16 %v395_v28, %v393_v27  ;;  %v398_v31 = vld [vmem:[%s2633_s19 + $0x1a8] sm:$0xff]  ;;  %v400_v32 = vld [vmem:[%s2633_s19 + $0x1b8] sm:$0xff]  ;;  %v349_v34 = vld [vmem:[%s2633_s19 + $0x20] sm:$0xff]  ;;  %p2378_p7 = por %p2377_p3, %p2376_p5 }
  0x70   : > { %1801 = vmatpush3.bf16.msra.mxu0 %v2228_v5  ;;  %2134 = vmatpush3.bf16.msra.mxu1 %v2228_v5  ;;  %v436_v33 = vpack.c.bf16 %v400_v32, %v398_v31  ;;  %v351_v35 = vld [vmem:[%s2633_s19 + $0x30] sm:$0xff]  ;;  %v354_v36 = vld [vmem:[%s2633_s19 + $0x48] sm:$0xff]  ;;  %v356_v37 = vld [vmem:[%s2633_s19 + $0x58] sm:$0xff] }
  0x71   : > { %1802 = vmatprep.subr.bf16.mxu0 %v2229_v6  ;;  %2127 = vmatprep.subr.bf16.mxu1 %v2229_v6  ;;  %v397_v38 = vld [vmem:[%s2633_s19 + $0x1a0] sm:$0xff]  ;;  %v399_v39 = vld [vmem:[%s2633_s19 + $0x1b0] sm:$0xff]  ;;  %v402_v40 = vld [vmem:[%s2633_s19 + $0x1c8] sm:$0xff]  ;;  %v411_v42 = vpack.c.bf16 %v351_v35, %v349_v34  ;;  %v414_v44 = vpack.c.bf16 %v356_v37, %v354_v36  ;;  %p2379_p9 = pnand %p2378_p7, %p2372_p0 }
  0x72   : > { %704 = vmatprep.mubr.bf16.mxu1 %v434_v26  ;;  %v404_v41 = vld [vmem:[%s2633_s19 + $0x1d8] sm:$0xff]  ;;  %v435_v45 = vpack.c.bf16 %v399_v39, %v397_v38  ;;  %v2240_v46 = vld [vmem:[#allocation7 + $0x30] sm:$0xff]   ;;  %v2241_v48 = vld [vmem:[#allocation7 + $0x28] sm:$0xff]  }
  0x73   : > { %v2239_v43 = vld [vmem:[#allocation7 + $0x38] sm:$0xff]   ;;  %v438_v47 = vpack.c.bf16 %v404_v41, %v402_v40  ;;  %v353_v49 = vld [vmem:[%s2633_s19 + $0x40] sm:$0xff]  ;;  %v355_v50 = vld [vmem:[%s2633_s19 + $0x50] sm:$0xff] }
  0x74   : > { %1803 = vmatpush3.bf16.msra.mxu0 %v2230_v7  ;;  %2135 = vmatpush3.bf16.msra.mxu1 %v2230_v7  ;;  %v358_v51 = vld [vmem:[%s2633_s19 + $0x68] sm:$0xff]  ;;  %v360_v52 = vld [vmem:[%s2633_s19 + $0x78] sm:$0xff]  ;;  %v401_v53 = vld [vmem:[%s2633_s19 + $0x1c0] sm:$0xff]  ;;  %v413_v57 = vpack.c.bf16 %v355_v50, %v353_v49 }
  0x75   : > { %1804 = vmatprep.subr.bf16.mxu0 %v2231_v8  ;;  %2128 = vmatprep.subr.bf16.mxu1 %v2231_v8  ;;  %v403_v54 = vld [vmem:[%s2633_s19 + $0x1d0] sm:$0xff]  ;;  %v406_v55 = vld [vmem:[%s2633_s19 + $0x1e8] sm:$0xff]  ;;  %v408_v56 = vld [vmem:[%s2633_s19 + $0x1f8] sm:$0xff]  ;;  %v416_v58 = vpack.c.bf16 %v360_v52, %v358_v51 }
  0x76   : > { %v437_v59 = vpack.c.bf16 %v403_v54, %v401_v53  ;;  %v440_v60 = vpack.c.bf16 %v408_v56, %v406_v55  ;;  %v357_v61 = vld [vmem:[%s2633_s19 + $0x60] sm:$0xff]  ;;  %v359_v62 = vld [vmem:[%s2633_s19 + $0x70] sm:$0xff]  ;;  %v362_v63 = vld [vmem:[%s2633_s19 + $0x88] sm:$0xff] }
  0x77   : > { %v364_v0 = vld [vmem:[%s2633_s19 + $0x98] sm:$0xff]  ;;  %v405_v1 = vld [vmem:[%s2633_s19 + $0x1e0] sm:$0xff]  ;;  %v407_v2 = vld [vmem:[%s2633_s19 + $0x1f0] sm:$0xff]  ;;  %v415_v3 = vpack.c.bf16 %v359_v62, %v357_v61 }
  0x78   : > { %1805 = vmatpush3.bf16.msra.mxu0 %v2232_v9  ;;  %2136 = vmatpush3.bf16.msra.mxu1 %v2232_v9  ;;  %v418_v4 = vpack.c.bf16 %v364_v0, %v362_v63  ;;  %v439_v5 = vpack.c.bf16 %v407_v2, %v405_v1  ;;  %v361_v6 = vld [vmem:[%s2633_s19 + $0x80] sm:$0xff]  ;;  %v363_v7 = vld [vmem:[%s2633_s19 + $0x90] sm:$0xff]  ;;  %v366_v8 = vld [vmem:[%s2633_s19 + $0xa8] sm:$0xff] }
  0x79   : > { %1806 = vmatprep.subr.bf16.mxu0 %v2233_v10  ;;  %2129 = vmatprep.subr.bf16.mxu1 %v2233_v10  ;;  %v368_v9 = vld [vmem:[%s2633_s19 + $0xb8] sm:$0xff]  ;;  %v417_v10 = vpack.c.bf16 %v363_v7, %v361_v6  ;;  %v365_v12 = vld [vmem:[%s2633_s19 + $0xa0] sm:$0xff]  ;;  %v367_v13 = vld [vmem:[%s2633_s19 + $0xb0] sm:$0xff] }
  0x7a   : > { %v420_v11 = vpack.c.bf16 %v368_v9, %v366_v8  ;;  %v371_v19 = vld [vmem:[%s2633_s19 + $0xd0] sm:$0xff]  ;;  %v374_v20 = vld [vmem:[%s2633_s19 + $0xe8] sm:$0xff]  ;;  %v376_v21 = vld [vmem:[%s2633_s19 + $0xf8] sm:$0xff] }
  0x7b   : > { %v424_v23 = vpack.c.bf16 %v376_v21, %v374_v20  ;;  %v373_v24 = vld [vmem:[%s2633_s19 + $0xe0] sm:$0xff]  ;;  %v378_v26 = vld [vmem:[%s2633_s19 + $0x108] sm:$0xff]  ;;  %v380_v27 = vld [vmem:[%s2633_s19 + $0x118] sm:$0xff] }
  0x7c   : > { %1807 = vmatpush3.bf16.msra.mxu0 %v2234_v14  ;;  %2137 = vmatpush3.bf16.msra.mxu1 %v2234_v14  ;;  %v370_v14 = vld [vmem:[%s2633_s19 + $0xc8] sm:$0xff]  ;;  %v379_v31 = vld [vmem:[%s2633_s19 + $0x110] sm:$0xff]  ;;  %v381_v36 = vld [vmem:[%s2633_s19 + $0x120] sm:$0xff] }
  0x7d   : > { %1808 = vmatprep.subr.bf16.mxu0 %v2235_v15  ;;  %2130 = vmatprep.subr.bf16.mxu1 %v2235_v15  ;;  %v372_v15 = vld [vmem:[%s2633_s19 + $0xd8] sm:$0xff]  ;;  %v382_v32 = vld [vmem:[%s2633_s19 + $0x128] sm:$0xff]  ;;  %v383_v37 = vld [vmem:[%s2633_s19 + $0x130] sm:$0xff] }
  0x7e   : > { %v2242_v38 = vld [vmem:[#allocation7 + $0x20] sm:$0xff]   ;;  %v386_v39 = vld [vmem:[%s2633_s19 + $0x148] sm:$0xff]  ;;  %v388_v40 = vld [vmem:[%s2633_s19 + $0x158] sm:$0xff]  ;;  %v427_v41 = vpack.c.bf16 %v383_v37, %v381_v36 }
  0x7f   : > { %v2245_v51 = vld [vmem:[#allocation7 + $0x8] sm:$0xff]   ;;  %v389_v52 = vld [vmem:[%s2633_s19 + $0x160] sm:$0xff]  ;;  %v391_v53 = vld [vmem:[%s2633_s19 + $0x170] sm:$0xff] }
  0x80   : > { %1809 = vmatpush3.bf16.msra.mxu0 %v2236_v16  ;;  %2138 = vmatpush3.bf16.msra.mxu1 %v2236_v16  ;;  %v419_v16 = vpack.c.bf16 %v367_v13, %v365_v12  ;;  %v2246_v54 = vld [vmem:[#allocation7] sm:$0xff]   ;;  %v431_v55 = vpack.c.bf16 %v391_v53, %v389_v52  ;;  %v2247_v56 = vld [vmem:[#allocation7 + $0x78] sm:$0xff]   ;;  %v2248_v20 = vld [vmem:[#allocation7 + $0x70] sm:$0xff]  }
  0x81   : > { %1810 = vmatprep.subr.bf16.mxu0 %v2237_v17  ;;  %2131 = vmatprep.subr.bf16.mxu1 %v2237_v17  ;;  %v422_v17 = vpack.c.bf16 %v372_v15, %v370_v14 }
  0x84   : > { %1811 = vmatpush3.bf16.msra.mxu0 %v2238_v18  ;;  %2139 = vmatpush3.bf16.msra.mxu1 %v2238_v18  ;;  %v369_v18 = vld [vmem:[%s2633_s19 + $0xc0] sm:$0xff] }
  0x85   : > { %1980 = vmatprep.subr.bf16.mxu1 %v2239_v43  ;;  %v421_v22 = vpack.c.bf16 %v371_v19, %v369_v18 }
  0x87   : > { %609 = vmatmul.mubr.bf16.vlgmr.msra.gmra.mxu0 %v409_v25  ;;  %705 = vmatmul.mubr.bf16.vlgmr.msra.gmra.mxu1 %v433_v30  ;;  %v375_v25 = vld [vmem:[%s2633_s19 + $0xf0] sm:$0xff]  ;;  %v377_v30 = vld [vmem:[%s2633_s19 + $0x100] sm:$0xff] }
  0x88   : > { %616 = vmatprep.mubr.bf16.mxu0 %v412_v29  ;;  %712 = vmatprep.mubr.bf16.mxu1 %v436_v33  ;;  %v423_v28 = vpack.c.bf16 %v375_v25, %v373_v24  ;;  %v426_v29 = vpack.c.bf16 %v380_v27, %v378_v26  ;;  %v384_v33 = vld [vmem:[%s2633_s19 + $0x138] sm:$0xff]  ;;  %v425_v34 = vpack.c.bf16 %v379_v31, %v377_v30  ;;  %v2249_v26 = vld [vmem:[#allocation7 + $0x68] sm:$0xff]  }
  0x89   : > { %1981 = vmatpush3.bf16.msra.mxu1 %v2239_v43  ;;  %v428_v35 = vpack.c.bf16 %v384_v33, %v382_v32  ;;  %v2243_v43 = vld [vmem:[#allocation7 + $0x18] sm:$0xff]   ;;  %v2250_v33 = vld [vmem:[#allocation7 + $0x60] sm:$0xff]  }
  0x8a   : > { %1982 = vmatprep.subr.bf16.mxu1 %v2240_v46 }
  0x8d   : > { %1983 = vmatpush3.bf16.msra.mxu1 %v2240_v46  ;;  %v2244_v46 = vld [vmem:[#allocation7 + $0x10] sm:$0xff]  }
  0x8e   : > { %1984 = vmatprep.subr.bf16.mxu1 %v2241_v48 }
  0x8f   : > { %617 = vmatmul.mubr.bf16.gmra.mxu0 %v411_v42  ;;  %713 = vmatmul.mubr.bf16.gmra.mxu1 %v435_v45  ;;  %v430_v42 = vpack.c.bf16 %v388_v40, %v386_v39  ;;  %v387_v45 = vld [vmem:[%s2633_s19 + $0x150] sm:$0xff]  ;;  %v2251_v39 = vld [vmem:[#allocation7 + $0x58] sm:$0xff]  }
  0x90   : > { %624 = vmatprep.mubr.bf16.mxu0 %v414_v44  ;;  %720 = vmatprep.mubr.bf16.mxu1 %v438_v47  ;;  %v385_v44 = vld [vmem:[%s2633_s19 + $0x140] sm:$0xff]  ;;  %v390_v47 = vld [vmem:[%s2633_s19 + $0x168] sm:$0xff] }
  0x91   : > { %1985 = vmatpush3.bf16.msra.mxu1 %v2241_v48  ;;  %v392_v48 = vld [vmem:[%s2633_s19 + $0x178] sm:$0xff]  ;;  %v429_v49 = vpack.c.bf16 %v387_v45, %v385_v44 }
  0x92   : > { %1986 = vmatprep.subr.bf16.mxu1 %v2242_v38  ;;  %v432_v50 = vpack.c.bf16 %v392_v48, %v390_v47 }
  0x95   : > { %1987 = vmatpush3.bf16.msra.mxu1 %v2242_v38 }
  0x96   : > { %1988 = vmatprep.subr.bf16.mxu1 %v2243_v43 }
  0x97   : > { %625 = vmatmul.mubr.bf16.gmra.mxu0 %v413_v57  ;;  %721 = vmatmul.mubr.bf16.gmra.mxu1 %v437_v59 }
  0x98   : > { %632 = vmatprep.mubr.bf16.mxu0 %v416_v58  ;;  %728 = vmatprep.mubr.bf16.mxu1 %v440_v60  ;;  %v2714_v60 = vld [vmem:[%s2967_s2] ss:$0 sm:$0xff] }
  0x99   : > { %1989 = vmatpush3.bf16.msra.mxu1 %v2243_v43 }
  0x9a   : > { %1990 = vmatprep.subr.bf16.mxu1 %v2244_v46 }
  0x9d   : > { %1991 = vmatpush3.bf16.msra.mxu1 %v2244_v46 }
  0x9e   : > { %1992 = vmatprep.subr.bf16.mxu1 %v2245_v51 }
  0x9f   : > { %633 = vmatmul.mubr.bf16.gmra.mxu0 %v415_v3  ;;  %729 = vmatmul.mubr.bf16.gmra.mxu1 %v439_v5 }
  0xa0   : > { %640 = vmatprep.mubr.bf16.mxu0 %v418_v4 }
  0xa1   : > { %1993 = vmatpush3.bf16.msra.mxu1 %v2245_v51 }
  0xa2   : > { %1994 = vmatprep.subr.bf16.mxu1 %v2246_v54 }
  0xa5   : > { %1995 = vmatpush3.bf16.msra.mxu1 %v2246_v54 }
  0xa6   : > { %2028 = vmatprep.subr.bf16.mxu1 %v2247_v56 }
  0xa7   : > { %641 = vmatmul.mubr.bf16.gmra.mxu0 %v417_v10 }
  0xa8   : > { %648 = vmatprep.mubr.bf16.mxu0 %v420_v11 }
  0xaf   : > { %649 = vmatmul.mubr.bf16.gmra.mxu0 %v419_v16 }
  0xb0   : > { %656 = vmatprep.mubr.bf16.mxu0 %v422_v17 }
  0xb7   : > { %657 = vmatmul.mubr.bf16.gmra.mxu0 %v421_v22 }
  0xb8   : > { %664 = vmatprep.mubr.bf16.mxu0 %v424_v23 }
  0xbf   : > { %665 = vmatmul.mubr.bf16.gmra.mxu0 %v423_v28 }
  0xc0   : > { %672 = vmatprep.mubr.bf16.mxu0 %v426_v29 }
  0xc7   : > { %673 = vmatmul.mubr.bf16.gmra.mxu0 %v425_v34 }
  0xc8   : > { %680 = vmatprep.mubr.bf16.mxu0 %v428_v35 }
  0xcf   : > { %681 = vmatmul.mubr.bf16.gmra.mxu0 %v427_v41 }
  0xd0   : > { %688 = vmatprep.mubr.bf16.mxu0 %v430_v42 }
  0xd7   : > { %689 = vmatmul.mubr.bf16.gmra.mxu0 %v429_v49 }
  0xd8   : > { %696 = vmatprep.mubr.bf16.mxu0 %v432_v50 }
  0xdf   : > { %697 = vmatmul.mubr.bf16.gmra.mxu0 %v431_v55 }
 0x147   : > { %v1812_v57 = vpop.f32.mrf.mxu0  ;;  %v2726_v52 = vpop.f32.mrf.mxu1 }
 0x149   : > { %v1813_v58 = vpop.f32.mrf.mxu0 }
 0x14a   : > { %v1814_v59 = vadd.f32 %v1813_v58, %v1812_v57 }
 0x14b   : > { %v1815_v61 = vpop.f32.mrf.mxu0 }
 0x14c   : > { %v611_v63 = vadd.f32 %v1814_v59, %v2714_v60  ;;  %v2728_v59 = vpop.f32.mrf.mxu1 }
 0x14d   : > { %v1816_v62 = vpop.f32.mrf.mxu0 }
 0x14e   : > { %v1817_v0 = vadd.f32 %v1816_v62, %v1815_v61  ;;  %v737_v4 = vmax.f32 %v611_v63, 0.0 }
 0x14f   : > { %v1818_v1 = vpop.f32.mrf.mxu0 }
 0x150   : > { %v614_v2 = vadd.f32 %v1817_v0, %v2714_v60 }
 0x151   : > { %v1819_v3 = vpop.f32.mrf.mxu0 }
 0x152   : > { %v738_v5 = vmax.f32 %v614_v2, 0.0  ;;  %v1820_v6 = vadd.f32 %v1819_v3, %v1818_v1  ;;  %v2732_v2 = vpop.f32.mrf.mxu1 }
 0x153   : > { %v1821_v7 = vpop.f32.mrf.mxu0 }
 0x154   : > { %v769_v8 = vpack.c.bf16 %v738_v5, %v737_v4  ;;  %v619_v10 = vadd.f32 %v1820_v6, %v2714_v60 }
 0x155   : > { %v1822_v9 = vpop.f32.mrf.mxu0 }
 0x156   : > { %v1823_v11 = vadd.f32 %v1822_v9, %v1821_v7  ;;  %1996 = vmatprep.mubr.bf16.mxu1 %v769_v8  ;;  %v739_v15 = vmax.f32 %v619_v10, 0.0  ;;  %v2734_v9 = vpop.f32.mrf.mxu1 }
 0x157   : > { %v1824_v12 = vpop.f32.mrf.mxu0 }
 0x158   : > { %v622_v13 = vadd.f32 %v1823_v11, %v2714_v60 }
 0x159   : > { %v1825_v14 = vpop.f32.mrf.mxu0 }
 0x15a   : > { %v740_v16 = vmax.f32 %v622_v13, 0.0  ;;  %v1826_v17 = vadd.f32 %v1825_v14, %v1824_v12 }
 0x15b   : > { %v1827_v18 = vpop.f32.mrf.mxu0 }
 0x15c   : > { %v770_v19 = vpack.c.bf16 %v740_v16, %v739_v15  ;;  %v627_v22 = vadd.f32 %v1826_v17, %v2714_v60  ;;  %v2738_v15 = vpop.f32.mrf.mxu1 }
 0x15d   : > { %v1828_v21 = vpop.f32.mrf.mxu0 }
 0x15e   : > { %v1829_v23 = vadd.f32 %v1828_v21, %v1827_v18  ;;  %1997 = vmatmul.mubr.bf16.vlgmr.msra.gmra.mxu1 %v770_v19  ;;  %v741_v28 = vmax.f32 %v627_v22, 0.0  ;;  %v2740_v22 = vpop.f32.mrf.mxu1 }
 0x15f   : > { %v1830_v24 = vpop.f32.mrf.mxu0  ;;  %2029 = vmatpush3.bf16.msra.mxu1 %v2247_v56 }
 0x160   : > { %v630_v25 = vadd.f32 %v1829_v23, %v2714_v60  ;;  %2030 = vmatprep.subr.bf16.mxu1 %v2248_v20 }
 0x161   : > { %v1831_v27 = vpop.f32.mrf.mxu0 }
 0x162   : > { %v742_v29 = vmax.f32 %v630_v25, 0.0  ;;  %v1832_v30 = vadd.f32 %v1831_v27, %v1830_v24 }
 0x163   : > { %v1833_v31 = vpop.f32.mrf.mxu0  ;;  %2031 = vmatpush3.bf16.msra.mxu1 %v2248_v20 }
 0x164   : > { %v771_v32 = vpack.c.bf16 %v742_v29, %v741_v28  ;;  %2032 = vmatprep.subr.bf16.mxu1 %v2249_v26  ;;  %v635_v35 = vadd.f32 %v1832_v30, %v2714_v60  ;;  %v2744_v28 = vpop.f32.mrf.mxu1 }
 0x165   : > { %v1834_v34 = vpop.f32.mrf.mxu0 }
 0x166   : > { %v1835_v36 = vadd.f32 %v1834_v34, %v1833_v31  ;;  %2000 = vmatprep.mubr.bf16.mxu1 %v771_v32  ;;  %v743_v41 = vmax.f32 %v635_v35, 0.0  ;;  %v1894_v35 = vpop.f32.mrf.mxu1 }
 0x167   : > { %v1836_v37 = vpop.f32.mrf.mxu0  ;;  %2033 = vmatpush3.bf16.msra.mxu1 %v2249_v26 }
 0x168   : > { %v638_v38 = vadd.f32 %v1835_v36, %v2714_v60  ;;  %2034 = vmatprep.subr.bf16.mxu1 %v2250_v33 }
 0x169   : > { %v1837_v40 = vpop.f32.mrf.mxu0 }
 0x16a   : > { %v744_v42 = vmax.f32 %v638_v38, 0.0  ;;  %v1838_v43 = vadd.f32 %v1837_v40, %v1836_v37 }
 0x16b   : > { %v1839_v44 = vpop.f32.mrf.mxu0  ;;  %2035 = vmatpush3.bf16.msra.mxu1 %v2250_v33 }
 0x16c   : > { %v772_v45 = vpack.c.bf16 %v744_v42, %v743_v41  ;;  %2036 = vmatprep.subr.bf16.mxu1 %v2251_v39  ;;  %v643_v47 = vadd.f32 %v1838_v43, %v2714_v60  ;;  %v1896_v41 = vpop.f32.mrf.mxu1 }
 0x16d   : > { %v1840_v46 = vpop.f32.mrf.mxu0 }
 0x16e   : > { %v1841_v48 = vadd.f32 %v1840_v46, %v1839_v44  ;;  %2001 = vmatmul.mubr.bf16.gmra.mxu1 %v772_v45  ;;  %v745_v53 = vmax.f32 %v643_v47, 0.0 }
 0x16f   : > { %v1842_v49 = vpop.f32.mrf.mxu0  ;;  %2037 = vmatpush3.bf16.msra.mxu1 %v2251_v39 }
 0x170   : > { %v646_v50 = vadd.f32 %v1841_v48, %v2714_v60  ;;  %v1897_v48 = vpop.f32.mrf.mxu1 }
 0x171   : > { %v1843_v51 = vpop.f32.mrf.mxu0 }
 0x172   : > { %v746_v54 = vmax.f32 %v646_v50, 0.0  ;;  %v1844_v55 = vadd.f32 %v1843_v51, %v1842_v49 }
 0x173   : > { %v1845_v56 = vpop.f32.mrf.mxu0 }
 0x174   : > { %v773_v57 = vpack.c.bf16 %v746_v54, %v745_v53  ;;  %v651_v61 = vadd.f32 %v1844_v55, %v2714_v60  ;;  %v1899_v55 = vpop.f32.mrf.mxu1 }
 0x175   : > { %v1846_v58 = vpop.f32.mrf.mxu0 }
 0x176   : > { %v1847_v62 = vadd.f32 %v1846_v58, %v1845_v56  ;;  %2004 = vmatprep.mubr.bf16.mxu1 %v773_v57  ;;  %v747_v3 = vmax.f32 %v651_v61, 0.0 }
 0x177   : > { %v1848_v63 = vpop.f32.mrf.mxu0 }
 0x178   : > { %v654_v0 = vadd.f32 %v1847_v62, %v2714_v60 }
 0x179   : > { %v1849_v1 = vpop.f32.mrf.mxu0 }
 0x17a   : > { %v748_v4 = vmax.f32 %v654_v0, 0.0  ;;  %v1850_v5 = vadd.f32 %v1849_v1, %v1848_v63  ;;  %v1900_v0 = vpop.f32.mrf.mxu1 }
 0x17b   : > { %v1851_v6 = vpop.f32.mrf.mxu0 }
 0x17c   : > { %v774_v7 = vpack.c.bf16 %v748_v4, %v747_v3  ;;  %v659_v10 = vadd.f32 %v1850_v5, %v2714_v60  ;;  %v2252_v4 = vld [vmem:[#allocation7 + $0x50] sm:$0xff]  }
 0x17d   : > { %v1852_v8 = vpop.f32.mrf.mxu0  ;;  %2038 = vmatprep.subr.bf16.mxu1 %v2252_v4 }
 0x17e   : > { %v1853_v11 = vadd.f32 %v1852_v8, %v1851_v6  ;;  %2005 = vmatmul.mubr.bf16.gmra.mxu1 %v774_v7  ;;  %v749_v16 = vmax.f32 %v659_v10, 0.0  ;;  %v1886_v7 = vadd.f32 %v2728_v59, %v2726_v52  ;;  %v1889_v8 = vadd.f32 %v2734_v9, %v2732_v2  ;;  %v2254_v2 = vld [vmem:[#allocation7 + $0x40] sm:$0xff]  }
 0x17f   : > { %v1854_v12 = vpop.f32.mrf.mxu0  ;;  %2039 = vmatpush3.bf16.msra.mxu1 %v2252_v4  ;;  %v1892_v9 = vadd.f32 %v2740_v22, %v2738_v15 }
 0x180   : > { %v662_v13 = vadd.f32 %v1853_v11, %v2714_v60  ;;  %v1902_v11 = vpop.f32.mrf.mxu1 }
 0x181   : > { %v1855_v14 = vpop.f32.mrf.mxu0 }
 0x182   : > { %v750_v17 = vmax.f32 %v662_v13, 0.0  ;;  %v1856_v18 = vadd.f32 %v1855_v14, %v1854_v12 }
 0x183   : > { %v1857_v19 = vpop.f32.mrf.mxu0 }
 0x184   : > { %v775_v20 = vpack.c.bf16 %v750_v17, %v749_v16  ;;  %v667_v23 = vadd.f32 %v1856_v18, %v2714_v60  ;;  %v2253_v16 = vld [vmem:[#allocation7 + $0x48] sm:$0xff]  }
 0x185   : > { %v1858_v21 = vpop.f32.mrf.mxu0  ;;  %2040 = vmatprep.subr.bf16.mxu1 %v2253_v16 }
 0x186   : > { %v1859_v24 = vadd.f32 %v1858_v21, %v1857_v19  ;;  %2008 = vmatprep.mubr.bf16.mxu1 %v775_v20  ;;  %v751_v29 = vmax.f32 %v667_v23, 0.0  ;;  %v707_v19 = vadd.f32 %v1886_v7, %v2714_v60  ;;  %v710_v20 = vadd.f32 %v1889_v8, %v2714_v60  ;;  %v1903_v23 = vpop.f32.mrf.mxu1  ;;  %2041 = vmatpush3.bf16.msra.mxu1 %v2253_v16 }
 0x187   : > { %v1860_v25 = vpop.f32.mrf.mxu0  ;;  %2042 = vmatprep.subr.bf16.mxu1 %v2254_v2 }
 0x188   : > { %v670_v26 = vadd.f32 %v1859_v24, %v2714_v60  ;;  %v1895_v24 = vadd.f32 %v1894_v35, %v2744_v28 }
 0x189   : > { %v1861_v27 = vpop.f32.mrf.mxu0 }
 0x18a   : > { %v752_v30 = vmax.f32 %v670_v26, 0.0  ;;  %v1862_v31 = vadd.f32 %v1861_v27, %v1860_v25  ;;  %v761_v26 = vmax.f32 %v707_v19, 0.0  ;;  %v762_v27 = vmax.f32 %v710_v20, 0.0  ;;  %2043 = vmatpush3.bf16.msra.mxu1 %v2254_v2 }
 0x18b   : > { %v1863_v32 = vpop.f32.mrf.mxu0 }
 0x18c   : > { %v776_v33 = vpack.c.bf16 %v752_v30, %v751_v29  ;;  %v675_v36 = vadd.f32 %v1862_v31, %v2714_v60  ;;  %v1898_v29 = vadd.f32 %v1897_v48, %v1896_v41  ;;  %v1901_v30 = vadd.f32 %v1900_v0, %v1899_v55  ;;  %v1905_v31 = vpop.f32.mrf.mxu1  ;;  %v2258_v55 = vld [vmem:[#allocation8 + $0x20] sm:$0xff]  }
 0x18d   : > { %v1864_v34 = vpop.f32.mrf.mxu0  ;;  %v781_v35 = vpack.c.bf16 %v762_v27, %v761_v26 }
 0x18e   : > { %v1865_v37 = vadd.f32 %v1864_v34, %v1863_v32  ;;  %2009 = vmatmul.mubr.bf16.gmra.mxu1 %v776_v33  ;;  %v753_v42 = vmax.f32 %v675_v36, 0.0  ;;  %v715_v34 = vadd.f32 %v1892_v9, %v2714_v60  ;;  %v718_v36 = vadd.f32 %v1895_v24, %v2714_v60  ;;  %v1906_v28 = vpop.f32.mrf.mxu1 }
 0x18f   : > { %v1866_v38 = vpop.f32.mrf.mxu0  ;;  %v723_v15 = vadd.f32 %v1898_v29, %v2714_v60  ;;  %v726_v22 = vadd.f32 %v1901_v30, %v2714_v60  ;;  %v1907_v41 = vadd.f32 %v1906_v28, %v1905_v31 }
 0x190   : > { %v678_v39 = vadd.f32 %v1865_v37, %v2714_v60 }
 0x191   : > { %v1867_v40 = vpop.f32.mrf.mxu0 }
 0x192   : > { %v754_v43 = vmax.f32 %v678_v39, 0.0  ;;  %v1868_v44 = vadd.f32 %v1867_v40, %v1866_v38  ;;  %v763_v38 = vmax.f32 %v715_v34, 0.0  ;;  %v764_v39 = vmax.f32 %v718_v36, 0.0 }
 0x193   : > { %v1869_v45 = vpop.f32.mrf.mxu0  ;;  %v1904_v40 = vadd.f32 %v1903_v23, %v1902_v11 }
 0x194   : > { %v777_v46 = vpack.c.bf16 %v754_v43, %v753_v42  ;;  %v683_v49 = vadd.f32 %v1868_v44, %v2714_v60  ;;  %v765_v42 = vmax.f32 %v723_v15, 0.0  ;;  %v766_v43 = vmax.f32 %v726_v22, 0.0 }
 0x195   : > { %v1870_v47 = vpop.f32.mrf.mxu0  ;;  %v731_v44 = vadd.f32 %v1904_v40, %v2714_v60 }
 0x196   : > { %v1871_v50 = vadd.f32 %v1870_v47, %v1869_v45  ;;  %2012 = vmatprep.mubr.bf16.mxu1 %v777_v46  ;;  %v755_v56 = vmax.f32 %v683_v49, 0.0  ;;  %v734_v45 = vadd.f32 %v1907_v41, %v2714_v60  ;;  %v782_v46 = vpack.c.bf16 %v764_v39, %v763_v38 }
 0x197   : > { %v1872_v51 = vpop.f32.mrf.mxu0  ;;  %v783_v47 = vpack.c.bf16 %v766_v43, %v765_v42  ;;  %v767_v48 = vmax.f32 %v731_v44, 0.0 }
 0x198   : > { %v686_v53 = vadd.f32 %v1871_v50, %v2714_v60  ;;  %v768_v49 = vmax.f32 %v734_v45, 0.0 }
 0x199   : > { %v1873_v54 = vpop.f32.mrf.mxu0 }
 0x19a   : > { %v756_v57 = vmax.f32 %v686_v53, 0.0  ;;  %v1874_v58 = vadd.f32 %v1873_v54, %v1872_v51  ;;  %v784_v50 = vpack.c.bf16 %v768_v49, %v767_v48  ;;  %v2255_v51 = vld [vmem:[#allocation8 + $0x38] sm:$0xff]   ;;  %v2256_v53 = vld [vmem:[#allocation8 + $0x30] sm:$0xff]   ;;  %v2257_v54 = vld [vmem:[#allocation8 + $0x28] sm:$0xff]  }
 0x19b   : > { %v1875_v61 = vpop.f32.mrf.mxu0  ;;  %2076 = vmatprep.subr.bf16.mxu0 %v2255_v51 }
 0x19c   : > { %v778_v62 = vpack.c.bf16 %v756_v57, %v755_v56  ;;  %v691_v1 = vadd.f32 %v1874_v58, %v2714_v60  ;;  %2077 = vmatpush3.bf16.msra.mxu0 %v2255_v51  ;;  %v2772_v58 = vld [vmem:[%s2969_s4] ss:$0 sm:$0xff] }
 0x19d   : > { %v1876_v63 = vpop.f32.mrf.mxu0  ;;  %2078 = vmatprep.subr.bf16.mxu0 %v2256_v53 }
 0x19e   : > { %v1877_v3 = vadd.f32 %v1876_v63, %v1875_v61  ;;  %2013 = vmatmul.mubr.bf16.gmra.mxu1 %v778_v62  ;;  %v757_v12 = vmax.f32 %v691_v1, 0.0 }
 0x19f   : > { %v1878_v5 = vpop.f32.mrf.mxu0 }
 0x1a0   : > { %v694_v6 = vadd.f32 %v1877_v3, %v2714_v60  ;;  %2079 = vmatpush3.bf16.msra.mxu0 %v2256_v53 }
 0x1a1   : > { %v1879_v10 = vpop.f32.mrf.mxu0  ;;  %2080 = vmatprep.subr.bf16.mxu0 %v2257_v54 }
 0x1a2   : > { %v758_v13 = vmax.f32 %v694_v6, 0.0  ;;  %v1880_v14 = vadd.f32 %v1879_v10, %v1878_v5 }
 0x1a3   : > { %v1881_v17 = vpop.f32.mrf.mxu0 }
 0x1a4   : > { %v779_v18 = vpack.c.bf16 %v758_v13, %v757_v12  ;;  %v699_v52 = vadd.f32 %v1880_v14, %v2714_v60  ;;  %2081 = vmatpush3.bf16.msra.mxu0 %v2257_v54 }
 0x1a5   : > { %v1882_v21 = vpop.f32.mrf.mxu0  ;;  %2082 = vmatprep.subr.bf16.mxu0 %v2258_v55 }
 0x1a6   : > { %v1883_v59 = vadd.f32 %v1882_v21, %v1881_v17  ;;  %2016 = vmatprep.mubr.bf16.mxu1 %v779_v18  ;;  %v759_v32 = vmax.f32 %v699_v52, 0.0 }
 0x1a8   : > { %v702_v25 = vadd.f32 %v1883_v59, %v2714_v60  ;;  %v2259_v60 = vld [vmem:[#allocation8 + $0x18] sm:$0xff]   ;;  %2083 = vmatpush3.bf16.msra.mxu0 %v2258_v55 }
 0x1a9   : > { %2084 = vmatprep.subr.bf16.mxu0 %v2259_v60 }
 0x1aa   : > { %v760_v33 = vmax.f32 %v702_v25, 0.0 }
 0x1ac   : > { %v780_v37 = vpack.c.bf16 %v760_v33, %v759_v32  ;;  %2085 = vmatpush3.bf16.msra.mxu0 %v2259_v60 }
 0x1ae   : > { %2017 = vmatmul.mubr.bf16.gmra.mxu1 %v780_v37 }
 0x1af   : > { %2020 = vmatprep.mubr.bf16.mxu1 %v781_v35 }
 0x1b6   : > { %2021 = vmatmul.mubr.bf16.gmra.mxu1 %v782_v46 }
 0x1b7   : > { %2024 = vmatprep.mubr.bf16.mxu1 %v783_v47 }
 0x1be   : > { %2025 = vmatmul.mubr.bf16.gmra.mxu1 %v784_v50 }
 0x21e   : > { %v1998_v56 = vpop.f32.mrf.mxu1 }
 0x21f   : > { %v899_v0 = vadd.f32 %v1998_v56, %v2772_v58 }
 0x220   : > { %v890_v57 = vpop.f32.mrf.mxu1 }
 0x221   : > { %v891_v62 = vadd.f32 %v2772_v58, %v890_v57  ;;  %v1019_v7 = vmax.f32 %v899_v0, 0.0 }
 0x222   : > { %v1999_v61 = vpop.f32.mrf.mxu1 }
 0x223   : > { %v902_v63 = vadd.f32 %v1999_v61, %v2772_v58  ;;  %v1017_v5 = vmax.f32 %v891_v62, 0.0 }
 0x224   : > { %v893_v1 = vpop.f32.mrf.mxu1 }
 0x225   : > { %v894_v3 = vadd.f32 %v2772_v58, %v893_v1  ;;  %v1020_v4 = vmax.f32 %v902_v63, 0.0 }
 0x227   : > { %v1018_v6 = vmax.f32 %v894_v3, 0.0  ;;  %v1050_v10 = vpack.c.bf16 %v1020_v4, %v1019_v7  ;;  %v2260_v3 = vld [vmem:[#allocation8 + $0x10] sm:$0xff]  }
 0x228   : > { %2086 = vmatprep.subr.bf16.mxu0 %v2260_v3 }
 0x229   : > { %v1049_v8 = vpack.c.bf16 %v1018_v6, %v1017_v5  ;;  %2087 = vmatpush3.bf16.msra.mxu0 %v2260_v3  ;;  %v2261_v6 = vld [vmem:[#allocation8 + $0x8] sm:$0xff]  }
 0x22a   : > { %2088 = vmatprep.subr.bf16.mxu0 %v2261_v6 }
 0x22b   : > { %2044 = vmatprep.mubr.bf16.mxu1 %v1049_v8 }
 0x22c   : > { %2045 = vmatmul.mubr.bf16.vlgmr.msra.gmra.mxu1 %v1050_v10 }
 0x22d   : > { %2089 = vmatpush3.bf16.msra.mxu0 %v2261_v6 }
 0x22e   : > { %v2002_v11 = vpop.f32.mrf.mxu1 }
 0x22f   : > { %v915_v17 = vadd.f32 %v2002_v11, %v2772_v58 }
 0x230   : > { %v906_v12 = vpop.f32.mrf.mxu1 }
 0x231   : > { %v907_v14 = vadd.f32 %v2772_v58, %v906_v12  ;;  %v1023_v52 = vmax.f32 %v915_v17, 0.0 }
 0x232   : > { %v2003_v13 = vpop.f32.mrf.mxu1 }
 0x233   : > { %v918_v16 = vadd.f32 %v2003_v13, %v2772_v58  ;;  %v1021_v21 = vmax.f32 %v907_v14, 0.0  ;;  %v2262_v13 = vld [vmem:[#allocation8] sm:$0xff]  }
 0x234   : > { %v909_v18 = vpop.f32.mrf.mxu1  ;;  %2090 = vmatprep.subr.bf16.mxu0 %v2262_v13 }
 0x235   : > { %v910_v19 = vadd.f32 %v2772_v58, %v909_v18  ;;  %v1024_v20 = vmax.f32 %v918_v16, 0.0  ;;  %2091 = vmatpush3.bf16.msra.mxu0 %v2262_v13 }
 0x237   : > { %v1022_v23 = vmax.f32 %v910_v19, 0.0  ;;  %v1052_v2 = vpack.c.bf16 %v1024_v20, %v1023_v52 }
 0x239   : > { %v1051_v59 = vpack.c.bf16 %v1022_v23, %v1021_v21 }
 0x23b   : > { %2048 = vmatprep.mubr.bf16.mxu1 %v1051_v59 }
 0x23c   : > { %2049 = vmatmul.mubr.bf16.gmra.mxu1 %v1052_v2 }
 0x23e   : > { %v2006_v9 = vpop.f32.mrf.mxu1 }
 0x23f   : > { %v931_v29 = vadd.f32 %v2006_v9, %v2772_v58 }
 0x240   : > { %v922_v24 = vpop.f32.mrf.mxu1 }
 0x241   : > { %v923_v26 = vadd.f32 %v2772_v58, %v922_v24  ;;  %v1027_v36 = vmax.f32 %v931_v29, 0.0 }
 0x242   : > { %v2007_v25 = vpop.f32.mrf.mxu1 }
 0x243   : > { %v934_v27 = vadd.f32 %v2007_v25, %v2772_v58  ;;  %v1025_v33 = vmax.f32 %v923_v26, 0.0 }
 0x244   : > { %v925_v30 = vpop.f32.mrf.mxu1 }
 0x245   : > { %v926_v31 = vadd.f32 %v2772_v58, %v925_v30  ;;  %v1028_v32 = vmax.f32 %v934_v27, 0.0 }
 0x247   : > { %v1026_v34 = vmax.f32 %v926_v31, 0.0  ;;  %v1054_v15 = vpack.c.bf16 %v1028_v32, %v1027_v36 }
 0x249   : > { %v1053_v37 = vpack.c.bf16 %v1026_v34, %v1025_v33 }
 0x24b   : > { %2052 = vmatprep.mubr.bf16.mxu1 %v1053_v37 }
 0x24c   : > { %2053 = vmatmul.mubr.bf16.gmra.mxu1 %v1054_v15 }
 0x24e   : > { %v2010_v22 = vpop.f32.mrf.mxu1 }
 0x24f   : > { %v947_v40 = vadd.f32 %v2010_v22, %v2772_v58 }
 0x250   : > { %v938_v28 = vpop.f32.mrf.mxu1 }
 0x251   : > { %v939_v38 = vadd.f32 %v2772_v58, %v938_v28  ;;  %v1031_v46 = vmax.f32 %v947_v40, 0.0 }
 0x252   : > { %v2011_v35 = vpop.f32.mrf.mxu1 }
 0x253   : > { %v950_v39 = vadd.f32 %v2011_v35, %v2772_v58  ;;  %v1029_v44 = vmax.f32 %v939_v38, 0.0 }
 0x254   : > { %v941_v41 = vpop.f32.mrf.mxu1 }
 0x255   : > { %v942_v42 = vadd.f32 %v2772_v58, %v941_v41  ;;  %v1032_v43 = vmax.f32 %v950_v39, 0.0 }
 0x257   : > { %v1030_v45 = vmax.f32 %v942_v42, 0.0  ;;  %v1056_v48 = vpack.c.bf16 %v1032_v43, %v1031_v46 }
 0x259   : > { %v1055_v47 = vpack.c.bf16 %v1030_v45, %v1029_v44 }
 0x25b   : > { %2056 = vmatprep.mubr.bf16.mxu1 %v1055_v47  ;;  %v2809_v47 = vld [vmem:[%s2969_s4 + $0x1] ss:$0 sm:$0xff] }
 0x25c   : > { %2057 = vmatmul.mubr.bf16.gmra.mxu1 %v1056_v48 }
 0x25e   : > { %v2014_v49 = vpop.f32.mrf.mxu1 }
 0x25f   : > { %v963_v55 = vadd.f32 %v2014_v49, %v2772_v58 }
 0x260   : > { %v954_v50 = vpop.f32.mrf.mxu1 }
 0x261   : > { %v955_v53 = vadd.f32 %v2772_v58, %v954_v50  ;;  %v1035_v63 = vmax.f32 %v963_v55, 0.0 }
 0x262   : > { %v2015_v51 = vpop.f32.mrf.mxu1 }
 0x263   : > { %v966_v54 = vadd.f32 %v2015_v51, %v2772_v58  ;;  %v1033_v61 = vmax.f32 %v955_v53, 0.0 }
 0x264   : > { %v957_v60 = vpop.f32.mrf.mxu1 }
 0x265   : > { %v958_v56 = vadd.f32 %v2772_v58, %v957_v60  ;;  %v1036_v57 = vmax.f32 %v966_v54, 0.0 }
 0x267   : > { %v1034_v62 = vmax.f32 %v958_v56, 0.0  ;;  %v1058_v1 = vpack.c.bf16 %v1036_v57, %v1035_v63 }
 0x269   : > { %v1057_v0 = vpack.c.bf16 %v1034_v62, %v1033_v61 }
 0x26b   : > { %2060 = vmatprep.mubr.bf16.mxu1 %v1057_v0 }
 0x26c   : > { %2061 = vmatmul.mubr.bf16.gmra.mxu1 %v1058_v1 }
 0x26e   : > { %v2018_v4 = vpop.f32.mrf.mxu1 }
 0x26f   : > { %v979_v11 = vadd.f32 %v2018_v4, %v2772_v58 }
 0x270   : > { %v970_v5 = vpop.f32.mrf.mxu1 }
 0x271   : > { %v971_v8 = vadd.f32 %v2772_v58, %v970_v5  ;;  %v1039_v20 = vmax.f32 %v979_v11, 0.0 }
 0x272   : > { %v2019_v7 = vpop.f32.mrf.mxu1 }
 0x273   : > { %v982_v10 = vadd.f32 %v2019_v7, %v2772_v58  ;;  %v1037_v18 = vmax.f32 %v971_v8, 0.0 }
 0x274   : > { %v973_v12 = vpop.f32.mrf.mxu1 }
 0x275   : > { %v974_v14 = vadd.f32 %v2772_v58, %v973_v12  ;;  %v1040_v16 = vmax.f32 %v982_v10, 0.0 }
 0x276   : > { %v2022_v17 = vpop.f32.mrf.mxu1 }
 0x277   : > { %v1038_v19 = vmax.f32 %v974_v14, 0.0  ;;  %v1060_v52 = vpack.c.bf16 %v1040_v16, %v1039_v20  ;;  %v995_v24 = vadd.f32 %v2022_v17, %v2772_v58 }
 0x278   : > { %v986_v21 = vpop.f32.mrf.mxu1 }
 0x279   : > { %v1059_v23 = vpack.c.bf16 %v1038_v19, %v1037_v18  ;;  %v987_v2 = vadd.f32 %v2772_v58, %v986_v21  ;;  %v1043_v32 = vmax.f32 %v995_v24, 0.0 }
 0x27a   : > { %v2023_v59 = vpop.f32.mrf.mxu1 }
 0x27b   : > { %v998_v9 = vadd.f32 %v2023_v59, %v2772_v58  ;;  %2064 = vmatprep.mubr.bf16.mxu1 %v1059_v23  ;;  %v1041_v30 = vmax.f32 %v987_v2, 0.0 }
 0x27c   : > { %v989_v25 = vpop.f32.mrf.mxu1  ;;  %2065 = vmatmul.mubr.bf16.gmra.mxu1 %v1060_v52 }
 0x27d   : > { %v990_v26 = vadd.f32 %v2772_v58, %v989_v25  ;;  %v1044_v27 = vmax.f32 %v998_v9, 0.0 }
 0x27e   : > { %v2026_v29 = vpop.f32.mrf.mxu1 }
 0x27f   : > { %v1042_v31 = vmax.f32 %v990_v26, 0.0  ;;  %v1062_v36 = vpack.c.bf16 %v1044_v27, %v1043_v32  ;;  %v1011_v28 = vadd.f32 %v2026_v29, %v2772_v58 }
 0x280   : > { %v1002_v33 = vpop.f32.mrf.mxu1 }
 0x281   : > { %v1061_v34 = vpack.c.bf16 %v1042_v31, %v1041_v30  ;;  %v1003_v15 = vadd.f32 %v2772_v58, %v1002_v33  ;;  %v1047_v42 = vmax.f32 %v1011_v28, 0.0 }
 0x282   : > { %v2027_v37 = vpop.f32.mrf.mxu1 }
 0x283   : > { %v1014_v22 = vadd.f32 %v2027_v37, %v2772_v58  ;;  %2068 = vmatprep.mubr.bf16.mxu1 %v1061_v34  ;;  %v1045_v40 = vmax.f32 %v1003_v15, 0.0 }
 0x284   : > { %v1005_v35 = vpop.f32.mrf.mxu1  ;;  %2069 = vmatmul.mubr.bf16.gmra.mxu1 %v1062_v36 }
 0x285   : > { %v1006_v38 = vadd.f32 %v2772_v58, %v1005_v35  ;;  %v1048_v39 = vmax.f32 %v1014_v22, 0.0 }
 0x287   : > { %v1046_v41 = vmax.f32 %v1006_v38, 0.0  ;;  %v1064_v44 = vpack.c.bf16 %v1048_v39, %v1047_v42 }
 0x289   : > { %v1063_v43 = vpack.c.bf16 %v1046_v41, %v1045_v40 }
 0x28b   : > { %2072 = vmatprep.mubr.bf16.mxu1 %v1063_v43 }
 0x28c   : > { %2073 = vmatmul.mubr.bf16.gmra.mxu1 %v1064_v44 }
 0x2ec   : > { %v2046_v45 = vpop.f32.mrf.mxu1 }
 0x2ed   : > { %v1181_v50 = vadd.f32 %v2046_v45, %v2809_v47 }
 0x2ee   : > { %v1172_v46 = vpop.f32.mrf.mxu1 }
 0x2ef   : > { %v1173_v49 = vadd.f32 %v2809_v47, %v1172_v46  ;;  %v1301_v56 = vmax.f32 %v1181_v50, 0.0 }
 0x2f0   : > { %v2047_v48 = vpop.f32.mrf.mxu1 }
 0x2f1   : > { %v1184_v58 = vadd.f32 %v2047_v48, %v2809_v47  ;;  %v1299_v55 = vmax.f32 %v1173_v49, 0.0 }
 0x2f2   : > { %v1175_v51 = vpop.f32.mrf.mxu1 }
 0x2f3   : > { %v1176_v53 = vadd.f32 %v2809_v47, %v1175_v51  ;;  %v1302_v54 = vmax.f32 %v1184_v58, 0.0 }
 0x2f5   : > { %v1300_v60 = vmax.f32 %v1176_v53, 0.0  ;;  %v1332_v61 = vpack.c.bf16 %v1302_v54, %v1301_v56 }
 0x2f7   : > { %v1331_v57 = vpack.c.bf16 %v1300_v60, %v1299_v55 }
 0x2f9   : > { %2092 = vmatprep.mubr.bf16.mxu0 %v1331_v57 }
 0x2fa   : > { %2093 = vmatmul.mubr.bf16.vlgmr.msra.gmra.mxu0 %v1332_v61 }
 0x2fc   : > { %v2050_v62 = vpop.f32.mrf.mxu1 }
 0x2fd   : > { %v1197_v4 = vadd.f32 %v2050_v62, %v2809_v47 }
 0x2fe   : > { %v1188_v63 = vpop.f32.mrf.mxu1 }
 0x2ff   : > { %v1189_v1 = vadd.f32 %v2809_v47, %v1188_v63  ;;  %v1305_v11 = vmax.f32 %v1197_v4, 0.0 }
 0x300   : > { %v2051_v0 = vpop.f32.mrf.mxu1 }
 0x301   : > { %v1200_v3 = vadd.f32 %v2051_v0, %v2809_v47  ;;  %v1303_v8 = vmax.f32 %v1189_v1, 0.0 }
 0x302   : > { %v1191_v5 = vpop.f32.mrf.mxu1 }
 0x303   : > { %v1192_v6 = vadd.f32 %v2809_v47, %v1191_v5  ;;  %v1306_v7 = vmax.f32 %v1200_v3, 0.0 }
 0x305   : > { %v1304_v10 = vmax.f32 %v1192_v6, 0.0  ;;  %v1334_v13 = vpack.c.bf16 %v1306_v7, %v1305_v11 }
 0x307   : > { %v1333_v12 = vpack.c.bf16 %v1304_v10, %v1303_v8 }
 0x309   : > { %2096 = vmatprep.mubr.bf16.mxu0 %v1333_v12 }
 0x30a   : > { %2097 = vmatmul.mubr.bf16.gmra.mxu0 %v1334_v13 }
 0x30c   : > { %v2054_v14 = vpop.f32.mrf.mxu1 }
 0x30d   : > { %v1213_v20 = vadd.f32 %v2054_v14, %v2809_v47 }
 0x30e   : > { %v1204_v16 = vpop.f32.mrf.mxu1 }
 0x30f   : > { %v1205_v18 = vadd.f32 %v2809_v47, %v1204_v16  ;;  %v1309_v9 = vmax.f32 %v1213_v20, 0.0 }
 0x310   : > { %v2055_v17 = vpop.f32.mrf.mxu1 }
 0x311   : > { %v1216_v19 = vadd.f32 %v2055_v17, %v2809_v47  ;;  %v1307_v59 = vmax.f32 %v1205_v18, 0.0 }
 0x312   : > { %v1207_v21 = vpop.f32.mrf.mxu1 }
 0x313   : > { %v1208_v23 = vadd.f32 %v2809_v47, %v1207_v21  ;;  %v1310_v52 = vmax.f32 %v1216_v19, 0.0 }
 0x315   : > { %v1308_v2 = vmax.f32 %v1208_v23, 0.0  ;;  %v1336_v25 = vpack.c.bf16 %v1310_v52, %v1309_v9 }
 0x317   : > { %v1335_v24 = vpack.c.bf16 %v1308_v2, %v1307_v59 }
 0x319   : > { %2100 = vmatprep.mubr.bf16.mxu0 %v1335_v24 }
 0x31a   : > { %2101 = vmatmul.mubr.bf16.gmra.mxu0 %v1336_v25 }
 0x31c   : > { %v2058_v26 = vpop.f32.mrf.mxu1 }
 0x31d   : > { %v1229_v32 = vadd.f32 %v2058_v26, %v2809_v47 }
 0x31e   : > { %v1220_v27 = vpop.f32.mrf.mxu1 }
 0x31f   : > { %v1221_v30 = vadd.f32 %v2809_v47, %v1220_v27  ;;  %v1313_v22 = vmax.f32 %v1229_v32, 0.0 }
 0x320   : > { %v2059_v29 = vpop.f32.mrf.mxu1 }
 0x321   : > { %v1232_v31 = vadd.f32 %v2059_v29, %v2809_v47  ;;  %v1311_v37 = vmax.f32 %v1221_v30, 0.0 }
 0x322   : > { %v1223_v33 = vpop.f32.mrf.mxu1 }
 0x323   : > { %v1224_v34 = vadd.f32 %v2809_v47, %v1223_v33  ;;  %v1314_v36 = vmax.f32 %v1232_v31, 0.0 }
 0x325   : > { %v1312_v15 = vmax.f32 %v1224_v34, 0.0  ;;  %v1338_v35 = vpack.c.bf16 %v1314_v36, %v1313_v22  ;;  %v2847_v34 = vld [vmem:[%s2971_s6] ss:$0 sm:$0xff] }
 0x327   : > { %v1337_v28 = vpack.c.bf16 %v1312_v15, %v1311_v37 }
 0x329   : > { %2104 = vmatprep.mubr.bf16.mxu0 %v1337_v28 }
 0x32a   : > { %2105 = vmatmul.mubr.bf16.gmra.mxu0 %v1338_v35 }
 0x32c   : > { %v2062_v38 = vpop.f32.mrf.mxu1 }
 0x32d   : > { %v1245_v43 = vadd.f32 %v2062_v38, %v2809_v47 }
 0x32e   : > { %v1236_v39 = vpop.f32.mrf.mxu1 }
 0x32f   : > { %v1237_v41 = vadd.f32 %v2809_v47, %v1236_v39  ;;  %v1317_v58 = vmax.f32 %v1245_v43, 0.0 }
 0x330   : > { %v2063_v40 = vpop.f32.mrf.mxu1 }
 0x331   : > { %v1248_v42 = vadd.f32 %v2063_v40, %v2809_v47  ;;  %v1315_v48 = vmax.f32 %v1237_v41, 0.0 }
 0x332   : > { %v1239_v44 = vpop.f32.mrf.mxu1 }
 0x333   : > { %v1240_v45 = vadd.f32 %v2809_v47, %v1239_v44  ;;  %v1318_v46 = vmax.f32 %v1248_v42, 0.0 }
 0x335   : > { %v1316_v49 = vmax.f32 %v1240_v45, 0.0  ;;  %v1340_v51 = vpack.c.bf16 %v1318_v46, %v1317_v58 }
 0x337   : > { %v1339_v50 = vpack.c.bf16 %v1316_v49, %v1315_v48 }
 0x339   : > { %2108 = vmatprep.mubr.bf16.mxu0 %v1339_v50 }
 0x33a   : > { %2109 = vmatmul.mubr.bf16.gmra.mxu0 %v1340_v51 }
 0x33c   : > { %v2066_v53 = vpop.f32.mrf.mxu1 }
 0x33d   : > { %v1261_v57 = vadd.f32 %v2066_v53, %v2809_v47 }
 0x33e   : > { %v1252_v54 = vpop.f32.mrf.mxu1 }
 0x33f   : > { %v1253_v60 = vadd.f32 %v2809_v47, %v1252_v54  ;;  %v1321_v4 = vmax.f32 %v1261_v57, 0.0 }
 0x340   : > { %v2067_v55 = vpop.f32.mrf.mxu1 }
 0x341   : > { %v1264_v56 = vadd.f32 %v2067_v55, %v2809_v47  ;;  %v1319_v1 = vmax.f32 %v1253_v60, 0.0 }
 0x342   : > { %v1255_v61 = vpop.f32.mrf.mxu1 }
 0x343   : > { %v1256_v62 = vadd.f32 %v2809_v47, %v1255_v61  ;;  %v1322_v63 = vmax.f32 %v1264_v56, 0.0 }
 0x344   : > { %v2070_v0 = vpop.f32.mrf.mxu1 }
 0x345   : > { %v1320_v3 = vmax.f32 %v1256_v62, 0.0  ;;  %v1342_v7 = vpack.c.bf16 %v1322_v63, %v1321_v4  ;;  %v1277_v12 = vadd.f32 %v2070_v0, %v2809_v47 }
 0x346   : > { %v1268_v5 = vpop.f32.mrf.mxu1 }
 0x347   : > { %v1341_v6 = vpack.c.bf16 %v1320_v3, %v1319_v1  ;;  %v1269_v10 = vadd.f32 %v2809_v47, %v1268_v5  ;;  %v1325_v20 = vmax.f32 %v1277_v12, 0.0 }
 0x348   : > { %v2071_v8 = vpop.f32.mrf.mxu1 }
 0x349   : > { %v1280_v11 = vadd.f32 %v2071_v8, %v2809_v47  ;;  %2112 = vmatprep.mubr.bf16.mxu0 %v1341_v6  ;;  %v1323_v18 = vmax.f32 %v1269_v10, 0.0 }
 0x34a   : > { %v1271_v13 = vpop.f32.mrf.mxu1  ;;  %2113 = vmatmul.mubr.bf16.gmra.mxu0 %v1342_v7 }
 0x34b   : > { %v1272_v14 = vadd.f32 %v2809_v47, %v1271_v13  ;;  %v1326_v16 = vmax.f32 %v1280_v11, 0.0 }
 0x34c   : > { %v2074_v17 = vpop.f32.mrf.mxu1 }
 0x34d   : > { %v1324_v19 = vmax.f32 %v1272_v14, 0.0  ;;  %v1344_v52 = vpack.c.bf16 %v1326_v16, %v1325_v20  ;;  %v1293_v24 = vadd.f32 %v2074_v17, %v2809_v47 }
 0x34e   : > { %v1284_v21 = vpop.f32.mrf.mxu1 }
 0x34f   : > { %v1343_v23 = vpack.c.bf16 %v1324_v19, %v1323_v18  ;;  %v1285_v2 = vadd.f32 %v2809_v47, %v1284_v21  ;;  %v1329_v31 = vmax.f32 %v1293_v24, 0.0 }
 0x350   : > { %v2075_v59 = vpop.f32.mrf.mxu1 }
 0x351   : > { %v1296_v9 = vadd.f32 %v2075_v59, %v2809_v47  ;;  %2116 = vmatprep.mubr.bf16.mxu0 %v1343_v23  ;;  %v1327_v29 = vmax.f32 %v1285_v2, 0.0 }
 0x352   : > { %v1287_v25 = vpop.f32.mrf.mxu1  ;;  %2117 = vmatmul.mubr.bf16.gmra.mxu0 %v1344_v52 }
 0x353   : > { %v1288_v26 = vadd.f32 %v2809_v47, %v1287_v25  ;;  %v1330_v27 = vmax.f32 %v1296_v9, 0.0 }
 0x355   : > { %v1328_v30 = vmax.f32 %v1288_v26, 0.0  ;;  %v1346_v33 = vpack.c.bf16 %v1330_v27, %v1329_v31 }
 0x357   : > { %v1345_v32 = vpack.c.bf16 %v1328_v30, %v1327_v29 }
 0x359   : > { %2120 = vmatprep.mubr.bf16.mxu0 %v1345_v32 }
 0x35a   : > { %2121 = vmatmul.mubr.bf16.gmra.mxu0 %v1346_v33 }
 0x3ba   : > { %v2094_v36 = vpop.f32.mrf.mxu0 }
 0x3bb   : > { %v1461_v37 = vadd.f32 %v2094_v36, %v2847_v34 }
 0x3bc   : > { %v1452_v15 = vpop.f32.mrf.mxu0 }
 0x3bd   : > { %1581 = vst [vmem:[%s2850_s15 + $0x10] sm:$0xff] %v1461_v37  ;;  %v1453_v47 = vadd.f32 %v2847_v34, %v1452_v15 }
 0x3be   : > { %v2095_v22 = vpop.f32.mrf.mxu0 }
 0x3bf   : > { %1579 = vst [vmem:[%s2850_s15] sm:$0xff] %v1453_v47  ;;  %v1464_v28 = vadd.f32 %v2095_v22, %v2847_v34 }
 0x3c0   : > { %v1455_v35 = vpop.f32.mrf.mxu0 }
 0x3c1   : > { %1582 = vst [vmem:[%s2850_s15 + $0x18] sm:$0xff] %v1464_v28  ;;  %v1456_v38 = vadd.f32 %v2847_v34, %v1455_v35 }
 0x3c3   : > { %1580 = vst [vmem:[%s2850_s15 + $0x8] sm:$0xff] %v1456_v38 }
 0x3ca   : > { %v2098_v39 = vpop.f32.mrf.mxu0 }
 0x3cb   : > { %v1477_v40 = vadd.f32 %v2098_v39, %v2847_v34 }
 0x3cc   : > { %v1468_v41 = vpop.f32.mrf.mxu0 }
 0x3cd   : > { %1585 = vst [vmem:[%s2850_s15 + $0x30] sm:$0xff] %v1477_v40  ;;  %v1469_v42 = vadd.f32 %v2847_v34, %v1468_v41 }
 0x3ce   : > { %v2099_v43 = vpop.f32.mrf.mxu0 }
 0x3cf   : > { %1583 = vst [vmem:[%s2850_s15 + $0x20] sm:$0xff] %v1469_v42  ;;  %v1480_v44 = vadd.f32 %v2099_v43, %v2847_v34 }
 0x3d0   : > { %v1471_v45 = vpop.f32.mrf.mxu0 }
 0x3d1   : > { %1586 = vst [vmem:[%s2850_s15 + $0x38] sm:$0xff] %v1480_v44  ;;  %v1472_v46 = vadd.f32 %v2847_v34, %v1471_v45 }
 0x3d3   : > { %1584 = vst [vmem:[%s2850_s15 + $0x28] sm:$0xff] %v1472_v46 }
 0x3da   : > { %v2102_v48 = vpop.f32.mrf.mxu0 }
 0x3db   : > { %v1493_v49 = vadd.f32 %v2102_v48, %v2847_v34 }
 0x3dc   : > { %v1484_v58 = vpop.f32.mrf.mxu0 }
 0x3dd   : > { %1589 = vst [vmem:[%s2850_s15 + $0x50] sm:$0xff] %v1493_v49  ;;  %v1485_v50 = vadd.f32 %v2847_v34, %v1484_v58 }
 0x3de   : > { %v2103_v51 = vpop.f32.mrf.mxu0 }
 0x3df   : > { %1587 = vst [vmem:[%s2850_s15 + $0x40] sm:$0xff] %v1485_v50  ;;  %v1496_v53 = vadd.f32 %v2103_v51, %v2847_v34 }
 0x3e0   : > { %v1487_v54 = vpop.f32.mrf.mxu0 }
 0x3e1   : > { %1590 = vst [vmem:[%s2850_s15 + $0x58] sm:$0xff] %v1496_v53  ;;  %v1488_v55 = vadd.f32 %v2847_v34, %v1487_v54 }
 0x3e3   : > { %1588 = vst [vmem:[%s2850_s15 + $0x48] sm:$0xff] %v1488_v55 }
 0x3ea   : > { %v2106_v60 = vpop.f32.mrf.mxu0 }
 0x3eb   : > { %v1509_v56 = vadd.f32 %v2106_v60, %v2847_v34 }
 0x3ec   : > { %v1500_v57 = vpop.f32.mrf.mxu0 }
 0x3ed   : > { %1593 = vst [vmem:[%s2850_s15 + $0x70] sm:$0xff] %v1509_v56  ;;  %v1501_v61 = vadd.f32 %v2847_v34, %v1500_v57 }
 0x3ee   : > { %v2107_v62 = vpop.f32.mrf.mxu0 }
 0x3ef   : > { %1591 = vst [vmem:[%s2850_s15 + $0x60] sm:$0xff] %v1501_v61  ;;  %v1512_v63 = vadd.f32 %v2107_v62, %v2847_v34 }
 0x3f0   : > { %v1503_v0 = vpop.f32.mrf.mxu0 }
 0x3f1   : > { %1594 = vst [vmem:[%s2850_s15 + $0x78] sm:$0xff] %v1512_v63  ;;  %v1504_v1 = vadd.f32 %v2847_v34, %v1503_v0 }
 0x3f3   : > { %1592 = vst [vmem:[%s2850_s15 + $0x68] sm:$0xff] %v1504_v1 }
 0x3fa   : > { %v2110_v3 = vpop.f32.mrf.mxu0 }
 0x3fb   : > { %v1525_v4 = vadd.f32 %v2110_v3, %v2847_v34 }
 0x3fc   : > { %v1516_v5 = vpop.f32.mrf.mxu0 }
 0x3fd   : > { %1597 = vst [vmem:[%s2850_s15 + $0x90] sm:$0xff] %v1525_v4  ;;  %v1517_v6 = vadd.f32 %v2847_v34, %v1516_v5 }
 0x3fe   : > { %v2111_v7 = vpop.f32.mrf.mxu0 }
 0x3ff   : > { %1595 = vst [vmem:[%s2850_s15 + $0x80] sm:$0xff] %v1517_v6  ;;  %v1528_v8 = vadd.f32 %v2111_v7, %v2847_v34 }
 0x400   : > { %v1519_v10 = vpop.f32.mrf.mxu0 }
 0x401   : > { %1598 = vst [vmem:[%s2850_s15 + $0x98] sm:$0xff] %v1528_v8  ;;  %v1520_v11 = vadd.f32 %v2847_v34, %v1519_v10 }
 0x403   : > { %1596 = vst [vmem:[%s2850_s15 + $0x88] sm:$0xff] %v1520_v11 }
 0x40a   : > { %v2114_v12 = vpop.f32.mrf.mxu0 }
 0x40b   : > { %v1541_v13 = vadd.f32 %v2114_v12, %v2847_v34 }
 0x40c   : > { %v1532_v14 = vpop.f32.mrf.mxu0 }
 0x40d   : > { %1601 = vst [vmem:[%s2850_s15 + $0xb0] sm:$0xff] %v1541_v13  ;;  %v1533_v16 = vadd.f32 %v2847_v34, %v1532_v14 }
 0x40e   : > { %v2115_v17 = vpop.f32.mrf.mxu0 }
 0x40f   : > { %1599 = vst [vmem:[%s2850_s15 + $0xa0] sm:$0xff] %v1533_v16  ;;  %v1544_v18 = vadd.f32 %v2115_v17, %v2847_v34 }
 0x410   : > { %v1535_v19 = vpop.f32.mrf.mxu0 }
 0x411   : > { %1602 = vst [vmem:[%s2850_s15 + $0xb8] sm:$0xff] %v1544_v18  ;;  %v1536_v20 = vadd.f32 %v2847_v34, %v1535_v19 }
 0x412   : > { %v2118_v21 = vpop.f32.mrf.mxu0 }
 0x413   : > { %1600 = vst [vmem:[%s2850_s15 + $0xa8] sm:$0xff] %v1536_v20  ;;  %v1557_v23 = vadd.f32 %v2118_v21, %v2847_v34 }
 0x414   : > { %v1548_v52 = vpop.f32.mrf.mxu0 }
 0x415   : > { %1605 = vst [vmem:[%s2850_s15 + $0xd0] sm:$0xff] %v1557_v23  ;;  %v1549_v59 = vadd.f32 %v2847_v34, %v1548_v52 }
 0x416   : > { %v2119_v2 = vpop.f32.mrf.mxu0 }
 0x417   : > { %1603 = vst [vmem:[%s2850_s15 + $0xc0] sm:$0xff] %v1549_v59  ;;  %v1560_v9 = vadd.f32 %v2119_v2, %v2847_v34 }
 0x418   : > { %v1551_v24 = vpop.f32.mrf.mxu0 }
 0x419   : > { %1606 = vst [vmem:[%s2850_s15 + $0xd8] sm:$0xff] %v1560_v9  ;;  %v1552_v25 = vadd.f32 %v2847_v34, %v1551_v24 }
 0x41a   : > { %v2122_v26 = vpop.f32.mrf.mxu0 }
 0x41b   : > { %1604 = vst [vmem:[%s2850_s15 + $0xc8] sm:$0xff] %v1552_v25  ;;  %v1573_v27 = vadd.f32 %v2122_v26, %v2847_v34 }
 0x41c   : > { %v1564_v29 = vpop.f32.mrf.mxu0 }
 0x41d   : > { %1609 = vst [vmem:[%s2850_s15 + $0xf0] sm:$0xff] %v1573_v27  ;;  %v1565_v30 = vadd.f32 %v2847_v34, %v1564_v29 }
 0x41e   : > { %v2123_v31 = vpop.f32.mrf.mxu0 }
 0x41f   : > { %1607 = vst [vmem:[%s2850_s15 + $0xe0] sm:$0xff] %v1565_v30  ;;  %v1576_v32 = vadd.f32 %v2123_v31, %v2847_v34 }
 0x420   : > { %v1567_v33 = vpop.f32.mrf.mxu0 }
 0x421   : > { %1610 = vst [vmem:[%s2850_s15 + $0xf8] sm:$0xff] %v1576_v32  ;;  %v1568_v36 = vadd.f32 %v2847_v34, %v1567_v33 }
 0x423   : > { %1608 = vst [vmem:[%s2850_s15 + $0xe8] sm:$0xff] %v1568_v36 }
 0x424   : > { %2382 = shalt.err (!%p2379_p9)
}
 0x425   : > { %s2383_s13 = scalar_lea.hbm %s2917_s30, 4096  ;;  %s2387_s12 = scalar_lea.hbm %s2972_s7, 8192 }
 0x426   : > { %p2384_p1 = scmp.ne.s32.totalorder %s2917_s30, %s2383_s13  ;;  %p2388_p11 = scmp.lt.s32.totalorder %s2917_s30, %s2972_s7 }
 0x427   : > { %p2389_p13 = scmp.lt.s32.totalorder %s2387_s12, %s2383_s13 }
 0x428   : > { %p2385_p8 = pnand %p2384_p1, %p2992_p6 }
 0x429   : > { %p2390_p2 = por %p2389_p13, %p2388_p11 }
 0x42a   : > { %p2386_p10 = pneg %p2385_p8 }
 0x42c   : > { %p2391_p4 = pnand %p2390_p2, %p2386_p10 }
 0x42e   : > { %2394 = shalt.err (!%p2391_p4)
}
 0x42f   : > { %s2452_s18 = smov 128   ;;  %s2453_s19 = smov 8  }
 0x430   : > { %2154 = dma.vmem_to_hbm [thread:$0]  (%p2992_p6), %s2919_s1, 4096, %s2917_s30, %s1612_s28, %s2452_s18, %s2452_s18, %s2453_s19  }
 0x431 PF: > { %s1640_s9 = sand.u32 1, %s2429_s24   ;;  %p2993_p12 = scmp.ne.s32.totalorder %s2979_s8, 0 }
 0x432   : > { %p2994_p0 = scmp.ge.s32.totalorder %s2441_s27, 2  ;;  %s1641_s23 = scalar_lea.sflag [#allocation4], %s1640_s9 }
 0x434   : > { %p2171_p5 = pnand %p2994_p0, %p2993_p12 }
 0x436   : > { %p2172_p3 = pneg %p2171_p5 }
 0x438   : > { %2424 = dma.done.wait (%p2172_p3), %s1641_s23, 4096  }
 0x439   : > { %2426 = vsyncadd (%p2172_p3), %s1641_s23, 4294963200  ;;  %p22_p7 = scmp.ge.s32.totalorder %s2574_s14, 4   ;;  %s2995_s24 = smov %s2433_s25 }
 0x43a   : > { %s2996_s25 = smov %s2437_s26  ;;  %s2997_s26 = smov %s2584_s17 }
 0x43b   : > { %s2998_s27 = smov %s2574_s14  ;;  %24 = sbr.rel (!%p22_p7) target bundleno = 9 (0x9), region = 107 }
 0x440   :  { %1646 = vsyncpa [#allocation3], 1 }
 0x441   :  { %1648 = vsyncpa [#allocation3 + $0x1], 1 }
 0x442   :  { %1649 = vsyncpa [#allocation6], 1 }
 0x443   :  { %1650 = vsyncpa [#allocation9], 1 }
 0x444   :  { %1651 = vsyncpa [#allocation4], 1 }
 0x445   :  { %1653 = vsyncpa [#allocation4 + $0x1], 1 }

</bundles_post_ra>
